<compile_context>
chip_gen: v6e
topology: v6e:2x2x1
jax: 0.10.0
libtpu: 0.0.40
codegen_flags: <defaults>
</compile_context>

<pallas_src>
import functools

import jax
import jax.numpy as jnp
from jax.experimental import pallas as pl
from jax.experimental.pallas import tpu as pltpu


def _dilated_conv_bn_relu_kernel(main_ref, halo_ref, w_ref, b_ref, *rest,
                                 TH, W, C, d, accumulate, emit_out):
    """One (batch, row-tile) step: 3x3 dilated conv + folded BN + ReLU [+ running sum].

    main_ref : (1, TH, W+2d, C)  padded input rows [t*TH, t*TH+TH)
    halo_ref : (1, 2d, W+2d, C)  padded input rows [t*TH+TH, t*TH+TH+2d)
    w_ref    : (9*C, C) bf16     im2col weight (BN scale folded in)
    b_ref    : (1, C)   f32      folded BN bias
    optional yin (1,TH,W,C), out (1,TH,W,C), yout (1,TH,W,C)
    scratch  : slab (TH+2d, W+2d, C) bf16 ; patch (TH*W, 9*C) bf16
    """
    idx = 0
    yin_ref = out_ref = yout_ref = None
    if accumulate:
        yin_ref = rest[idx]; idx += 1
    if emit_out:
        out_ref = rest[idx]; idx += 1
    if accumulate:
        yout_ref = rest[idx]; idx += 1
    slab_ref, patch_ref = rest[idx], rest[idx + 1]

    # Assemble the bf16 haloed row slab once; every tap window below is a ref slice of it.
    slab_ref[0:TH] = main_ref[0].astype(jnp.bfloat16)
    slab_ref[TH:TH + 2 * d] = halo_ref[0].astype(jnp.bfloat16)

    # im2col over the 9 dilated taps -> (TH*W, 9*C) in VMEM scratch, one fused MXU matmul.
    for kh in range(3):
        for kw in range(3):
            j = kh * 3 + kw
            win = slab_ref[kh * d:kh * d + TH, kw * d:kw * d + W, :]     # (TH, W, C)
            patch_ref[:, j * C:(j + 1) * C] = win.reshape(TH * W, C)

    acc = jnp.dot(patch_ref[...], w_ref[...],
                  preferred_element_type=jnp.float32)                    # (TH*W, C) f32
    res = jnp.maximum(acc + b_ref[...], 0.0).reshape(TH, W, C)           # BN bias + ReLU

    if emit_out:
        out_ref[0] = res.astype(out_ref.dtype)
    if accumulate:
        yout_ref[0] = yin_ref[0] + res.astype(yout_ref.dtype)


def _vmem_tile_budget():
    """Per-generation row-tile budget: ~1/8 of physical VMEM, floor 8 MiB."""
    try:
        cap = pltpu.get_tpu_info().vmem_capacity_bytes
    except Exception:
        cap = 128 * 1024 * 1024
    return max(cap // 8, 8 * 1024 * 1024)


def _choose_row_tile(H, W, C, d):
    """Largest TH with H % TH == 0, TH % (2d) == 0, tile footprint under budget."""
    budget = _vmem_tile_budget()
    cpad = -(-C // 128) * 128              # lane padding of the channel axis
    wp = W + 2 * d
    best = None
    for th in range(2 * d, H + 1, 2 * d):
        if H % th:
            continue
        streams = 2 * (th + 4 * d) * wp * cpad * 4     # main+halo, double-buffered
        streams += 3 * 2 * th * W * cpad * 4           # yin / out / yout, double-buffered
        scratch = (th + 2 * d) * wp * cpad * 2         # bf16 slab
        scratch += th * W * 9 * cpad * 2               # bf16 im2col patch
        if streams + scratch <= budget:
            best = th
    assert best is not None, "no legal row tile fits the VMEM budget"
    return best


def _fold_bn(w_hwio, scale, bias):
    """Fold eval-mode BN scale into the conv weight; build the fused (9*Cin, Cout) bf16
    im2col weight. The BN bias stays separate as f32 (1, Cout)."""
    kh, kw, cin, cout = w_hwio.shape
    w = w_hwio * scale.reshape(1, 1, 1, cout)
    return (w.reshape(kh * kw * cin, cout).astype(jnp.bfloat16),
            bias.reshape(1, cout).astype(jnp.float32))


def conv_bn_relu(x_nhwc, w2, b2, dilation, *, y_prev=None, emit_out=True, row_tile=None):
    """One ConvBNActivation level. Returns a tuple: (out?) then (running_sum?)."""
    N, H, W, C = x_nhwc.shape
    d = dilation
    assert H % (2 * d) == 0, "row-tiled halo path needs H % (2*dilation) == 0"
    # TODO(synk): ragged H (H % (2*dilation) != 0) fallback path is not implemented.
    TH = row_tile if row_tile is not None else _choose_row_tile(H, W, C, d)
    assert H % TH == 0 and TH % (2 * d) == 0

    Hp, Wp = H + 2 * d, W + 2 * d
    # TODO(synk): the per-level jnp.pad costs one extra HBM copy; in-kernel boundary
    # masking would remove it.
    xpad = jnp.pad(x_nhwc, ((0, 0), (d, d), (d, d), (0, 0)))
    hb = TH // (2 * d)
    accumulate = y_prev is not None

    main_spec = pl.BlockSpec((1, TH, Wp, C), lambda n, t: (n, t, 0, 0))
    halo_spec = pl.BlockSpec((1, 2 * d, Wp, C), lambda n, t: (n, (t + 1) * hb, 0, 0))
    w_spec = pl.BlockSpec((9 * C, C), lambda n, t: (0, 0))
    b_spec = pl.BlockSpec((1, C), lambda n, t: (0, 0))
    # TODO(synk): for C not a multiple of 128 these output stores are lane-masked; repack
    # (fold W into the lane axis) or require C % 128 == 0 for the production fast path.
    tile_spec = pl.BlockSpec((1, TH, W, C), lambda n, t: (n, t, 0, 0))

    in_specs = [main_spec, halo_spec, w_spec, b_spec]
    inputs = [xpad, xpad, w2, b2]
    out_shapes, out_specs, aliases = [], [], {}
    if accumulate:
        in_specs.append(tile_spec)
        inputs.append(y_prev)
    if emit_out:
        out_shapes.append(jax.ShapeDtypeStruct((N, H, W, C), x_nhwc.dtype))
        out_specs.append(tile_spec)
    if accumulate:
        aliases[4] = len(out_shapes)               # running-sum buffer reused in place
        out_shapes.append(jax.ShapeDtypeStruct((N, H, W, C), y_prev.dtype))
        out_specs.append(tile_spec)

    kernel = functools.partial(_dilated_conv_bn_relu_kernel, TH=TH, W=W, C=C, d=d,
                               accumulate=accumulate, emit_out=emit_out)
    return pl.pallas_call(
        kernel,
        out_shape=tuple(out_shapes),
        grid=(N, H // TH),
        in_specs=in_specs,
        out_specs=tuple(out_specs),
        scratch_shapes=[
            pltpu.VMEM((TH + 2 * d, Wp, C), jnp.bfloat16),   # haloed input slab
            pltpu.VMEM((TH * W, 9 * C), jnp.bfloat16),       # im2col patch
        ],
        input_output_aliases=aliases,
        compiler_params=pltpu.CompilerParams(
            dimension_semantics=("parallel", "parallel"),
            vmem_limit_bytes=32 * 1024 * 1024),
    )(*inputs)


def center_dilation(x_nchw, weights, bn_scales, bn_biases,
                    dilation_type="cascade", row_tile=None):
    """CenterDilation.forward. x_nchw: (N, C, H, W) -> (N, C, H, W)."""
    if dilation_type not in ("cascade", "parallel"):
        raise ValueError(f"dilation_type must be cascade|parallel, got {dilation_type}")
    x = jnp.transpose(x_nchw, (0, 2, 3, 1))     # NCHW -> NHWC
    depth = len(weights)
    y = None
    cur = x
    for i in range(depth):
        d = 2 ** i
        w2, b2 = _fold_bn(weights[i], bn_scales[i], bn_biases[i])
        inp = cur if dilation_type == "cascade" else x
        if y is None:
            (out,) = conv_bn_relu(inp, w2, b2, d, y_prev=None,
                                  emit_out=True, row_tile=row_tile)
            y = out
            cur = out
        else:
            need_out = dilation_type == "cascade" and i < depth - 1
            res = conv_bn_relu(inp, w2, b2, d, y_prev=y,
                               emit_out=need_out, row_tile=row_tile)
            if need_out:
                cur, y = res
            else:
                (y,) = res
    return jnp.transpose(y, (0, 3, 1, 2))       # NHWC -> NCHW


def center_dilation_reference(x_nchw, weights, bn_scales, bn_biases, dilation_type):
    """Pure-JAX f32 reference of the PyTorch module (eval-mode BN)."""
    x = jnp.transpose(x_nchw, (0, 2, 3, 1))
    outs = []
    cur = x
    for i, (w, s, b) in enumerate(zip(weights, bn_scales, bn_biases)):
        d = 2 ** i
        inp = cur if dilation_type == "cascade" else x
        y = jax.lax.conv_general_dilated(
            inp, w, window_strides=(1, 1), padding=((d, d), (d, d)),
            rhs_dilation=(d, d), dimension_numbers=("NHWC", "HWIO", "NHWC"),
            precision=jax.lax.Precision.HIGHEST)
        y = jnp.maximum(y * s + b, 0.0)
        outs.append(y)
        cur = y
    tot = outs[0]
    for o in outs[1:]:
        tot = tot + o
    return jnp.transpose(tot, (0, 3, 1, 2))


def make_params(key, in_channels, dilation_depth):
    """Deterministic synthetic parameters (Conv2d weights + eval-mode BN)."""
    weights, scales, biases = [], [], []
    eps = 1e-5
    for _ in range(dilation_depth):
        key, kw, kg, kb = jax.random.split(key, 4)
        # PyTorch Conv2d weight is (Cout, Cin, kh, kw); kernels use HWIO (kh, kw, Cin, Cout).
        w_oihw = jax.random.normal(kw, (in_channels, in_channels, 3, 3), jnp.float32) * 0.1
        w = jnp.transpose(w_oihw, (2, 3, 1, 0))
        gamma = 1.0 + 0.1 * jax.random.normal(kg, (in_channels,), jnp.float32)
        beta = 0.05 * jax.random.normal(kb, (in_channels,), jnp.float32)
        running_mean = jnp.zeros((in_channels,), jnp.float32)
        running_var = jnp.ones((in_channels,), jnp.float32)
        scale = gamma / jnp.sqrt(running_var + eps)
        bias = beta - running_mean * scale
        weights.append(w)
        scales.append(scale)
        biases.append(bias)
    return weights, scales, biases


if __name__ == "__main__":
    N, C, H, W = 2, 8, 16, 16
    dilation_depth = 2

    key = jax.random.PRNGKey(0)
    key, kx = jax.random.split(key)
    x = jax.random.normal(kx, (N, C, H, W), jnp.float32)
    weights, scales, biases = make_params(key, C, dilation_depth)

    # cascade, forcing 2 row tiles (exercises the halo BlockSpec path)
    out_c = jax.block_until_ready(
        center_dilation(x, weights, scales, biases, "cascade", row_tile=8))
    ref_c = center_dilation_reference(x, weights, scales, biases, "cascade")
    assert out_c.shape == (N, C, H, W), out_c.shape
    assert jnp.allclose(out_c, ref_c, rtol=5e-2, atol=5e-2), \
        float(jnp.max(jnp.abs(out_c - ref_c)))

    # parallel, using the auto row-tile chooser
    out_p = jax.block_until_ready(
        center_dilation(x, weights, scales, biases, "parallel"))
    ref_p = center_dilation_reference(x, weights, scales, biases, "parallel")
    assert jnp.allclose(out_p, ref_p, rtol=5e-2, atol=5e-2), \
        float(jnp.max(jnp.abs(out_p - ref_p)))

    print("KERNEL_OK")
</pallas_src>

<mosaic_0001>
module attributes {stable_mosaic.version = 11 : i64} {
  func.func @_dilated_conv_bn_relu_kernel(%arg0: i32, %arg1: i32, %arg2: memref<1x8x18x8xf32, #tpu.memory_space<vmem>>, %arg3: memref<1x2x18x8xf32, #tpu.memory_space<vmem>>, %arg4: memref<72x8xbf16, #tpu.memory_space<vmem>>, %arg5: memref<1x8xf32, #tpu.memory_space<vmem>>, %arg6: memref<1x8x16x8xf32, #tpu.memory_space<vmem>>, %arg7: memref<10x18x8xbf16, #tpu.memory_space<vmem>>, %arg8: memref<128x72xbf16, #tpu.memory_space<vmem>>) attributes {dimension_semantics = [#tpu.dimension_semantics<parallel>, #tpu.dimension_semantics<parallel>], iteration_bounds = array<i64: 2, 2>, scalar_prefetch = 0 : i64, scratch_operands = 2 : i64, tpu.core_type = #tpu.core_type<tc>, window_params = [{transform_indices = @transform_0, window_bounds = array<i64: 1, 8, 18, 8>}, {transform_indices = @transform_1, window_bounds = array<i64: 1, 2, 18, 8>}, {pipeline_mode = #tpu.pipeline_mode<synchronous>, transform_indices = @transform_2, window_bounds = array<i64: 72, 8>}, {pipeline_mode = #tpu.pipeline_mode<synchronous>, transform_indices = @transform_3, window_bounds = array<i64: 1, 8>}, {transform_indices = @transform_4, window_bounds = array<i64: 1, 8, 16, 8>}]} {
    %c0 = arith.constant 0 : index
    %c0_0 = arith.constant 0 : index
    %c0_1 = arith.constant 0 : index
    %c0_2 = arith.constant 0 : index
    %0 = vector.load %arg2[%c0, %c0_0, %c0_1, %c0_2] : memref<1x8x18x8xf32, #tpu.memory_space<vmem>>, vector<1x8x18x8xf32>
    %1 = vector.shape_cast %0 : vector<1x8x18x8xf32> to vector<8x18x8xf32>
    %2 = arith.truncf %1 : vector<8x18x8xf32> to vector<8x18x8xbf16>
    %c0_3 = arith.constant 0 : index
    %c0_4 = arith.constant 0 : index
    %c0_5 = arith.constant 0 : index
    %3 = vector.load %arg7[%c0_3, %c0_4, %c0_5] : memref<10x18x8xbf16, #tpu.memory_space<vmem>>, vector<8x18x8xbf16>
    tpu.vector_store %arg7[%c0_3, %c0_4, %c0_5], %2 {strides = array<i32>} : memref<10x18x8xbf16, #tpu.memory_space<vmem>>, vector<8x18x8xbf16>,
    %c0_6 = arith.constant 0 : index
    %c0_7 = arith.constant 0 : index
    %c0_8 = arith.constant 0 : index
    %c0_9 = arith.constant 0 : index
    %4 = vector.load %arg3[%c0_6, %c0_7, %c0_8, %c0_9] : memref<1x2x18x8xf32, #tpu.memory_space<vmem>>, vector<1x2x18x8xf32>
    %5 = vector.shape_cast %4 : vector<1x2x18x8xf32> to vector<2x18x8xf32>
    %6 = arith.truncf %5 : vector<2x18x8xf32> to vector<2x18x8xbf16>
    %c8 = arith.constant 8 : index
    %c0_10 = arith.constant 0 : index
    %c0_11 = arith.constant 0 : index
    %7 = vector.load %arg7[%c8, %c0_10, %c0_11] : memref<10x18x8xbf16, #tpu.memory_space<vmem>>, vector<2x18x8xbf16>
    tpu.vector_store %arg7[%c8, %c0_10, %c0_11], %6 {strides = array<i32>} : memref<10x18x8xbf16, #tpu.memory_space<vmem>>, vector<2x18x8xbf16>,
    %c0_12 = arith.constant 0 : index
    %c0_13 = arith.constant 0 : index
    %c0_14 = arith.constant 0 : index
    %8 = vector.load %arg7[%c0_12, %c0_13, %c0_14] : memref<10x18x8xbf16, #tpu.memory_space<vmem>>, vector<8x16x8xbf16>
    %9 = vector.shape_cast %8 : vector<8x16x8xbf16> to vector<128x8xbf16>
    %c0_15 = arith.constant 0 : index
    %c0_16 = arith.constant 0 : index
    %10 = vector.load %arg8[%c0_15, %c0_16] : memref<128x72xbf16, #tpu.memory_space<vmem>>, vector<128x8xbf16>
    tpu.vector_store %arg8[%c0_15, %c0_16], %9 {strides = array<i32>} : memref<128x72xbf16, #tpu.memory_space<vmem>>, vector<128x8xbf16>,
    %c0_17 = arith.constant 0 : index
    %c1 = arith.constant 1 : index
    %c0_18 = arith.constant 0 : index
    %11 = vector.load %arg7[%c0_17, %c1, %c0_18] : memref<10x18x8xbf16, #tpu.memory_space<vmem>>, vector<8x16x8xbf16>
    %12 = vector.shape_cast %11 : vector<8x16x8xbf16> to vector<128x8xbf16>
    %c0_19 = arith.constant 0 : index
    %c8_20 = arith.constant 8 : index
    %13 = vector.load %arg8[%c0_19, %c8_20] : memref<128x72xbf16, #tpu.memory_space<vmem>>, vector<128x8xbf16>
    tpu.vector_store %arg8[%c0_19, %c8_20], %12 {strides = array<i32>} : memref<128x72xbf16, #tpu.memory_space<vmem>>, vector<128x8xbf16>,
    %c0_21 = arith.constant 0 : index
    %c2 = arith.constant 2 : index
    %c0_22 = arith.constant 0 : index
    %14 = vector.load %arg7[%c0_21, %c2, %c0_22] : memref<10x18x8xbf16, #tpu.memory_space<vmem>>, vector<8x16x8xbf16>
    %15 = vector.shape_cast %14 : vector<8x16x8xbf16> to vector<128x8xbf16>
    %c0_23 = arith.constant 0 : index
    %c16 = arith.constant 16 : index
    %16 = vector.load %arg8[%c0_23, %c16] : memref<128x72xbf16, #tpu.memory_space<vmem>>, vector<128x8xbf16>
    tpu.vector_store %arg8[%c0_23, %c16], %15 {strides = array<i32>} : memref<128x72xbf16, #tpu.memory_space<vmem>>, vector<128x8xbf16>,
    %c1_24 = arith.constant 1 : index
    %c0_25 = arith.constant 0 : index
    %c0_26 = arith.constant 0 : index
    %17 = vector.load %arg7[%c1_24, %c0_25, %c0_26] : memref<10x18x8xbf16, #tpu.memory_space<vmem>>, vector<8x16x8xbf16>
    %18 = vector.shape_cast %17 : vector<8x16x8xbf16> to vector<128x8xbf16>
    %c0_27 = arith.constant 0 : index
    %c24 = arith.constant 24 : index
    %19 = vector.load %arg8[%c0_27, %c24] : memref<128x72xbf16, #tpu.memory_space<vmem>>, vector<128x8xbf16>
    tpu.vector_store %arg8[%c0_27, %c24], %18 {strides = array<i32>} : memref<128x72xbf16, #tpu.memory_space<vmem>>, vector<128x8xbf16>,
    %c1_28 = arith.constant 1 : index
    %c1_29 = arith.constant 1 : index
    %c0_30 = arith.constant 0 : index
    %20 = vector.load %arg7[%c1_28, %c1_29, %c0_30] : memref<10x18x8xbf16, #tpu.memory_space<vmem>>, vector<8x16x8xbf16>
    %21 = vector.shape_cast %20 : vector<8x16x8xbf16> to vector<128x8xbf16>
    %c0_31 = arith.constant 0 : index
    %c32 = arith.constant 32 : index
    %22 = vector.load %arg8[%c0_31, %c32] : memref<128x72xbf16, #tpu.memory_space<vmem>>, vector<128x8xbf16>
    tpu.vector_store %arg8[%c0_31, %c32], %21 {strides = array<i32>} : memref<128x72xbf16, #tpu.memory_space<vmem>>, vector<128x8xbf16>,
    %c1_32 = arith.constant 1 : index
    %c2_33 = arith.constant 2 : index
    %c0_34 = arith.constant 0 : index
    %23 = vector.load %arg7[%c1_32, %c2_33, %c0_34] : memref<10x18x8xbf16, #tpu.memory_space<vmem>>, vector<8x16x8xbf16>
    %24 = vector.shape_cast %23 : vector<8x16x8xbf16> to vector<128x8xbf16>
    %c0_35 = arith.constant 0 : index
    %c40 = arith.constant 40 : index
    %25 = vector.load %arg8[%c0_35, %c40] : memref<128x72xbf16, #tpu.memory_space<vmem>>, vector<128x8xbf16>
    tpu.vector_store %arg8[%c0_35, %c40], %24 {strides = array<i32>} : memref<128x72xbf16, #tpu.memory_space<vmem>>, vector<128x8xbf16>,
    %c2_36 = arith.constant 2 : index
    %c0_37 = arith.constant 0 : index
    %c0_38 = arith.constant 0 : index
    %26 = vector.load %arg7[%c2_36, %c0_37, %c0_38] : memref<10x18x8xbf16, #tpu.memory_space<vmem>>, vector<8x16x8xbf16>
    %27 = vector.shape_cast %26 : vector<8x16x8xbf16> to vector<128x8xbf16>
    %c0_39 = arith.constant 0 : index
    %c48 = arith.constant 48 : index
    %28 = vector.load %arg8[%c0_39, %c48] : memref<128x72xbf16, #tpu.memory_space<vmem>>, vector<128x8xbf16>
    tpu.vector_store %arg8[%c0_39, %c48], %27 {strides = array<i32>} : memref<128x72xbf16, #tpu.memory_space<vmem>>, vector<128x8xbf16>,
    %c2_40 = arith.constant 2 : index
    %c1_41 = arith.constant 1 : index
    %c0_42 = arith.constant 0 : index
    %29 = vector.load %arg7[%c2_40, %c1_41, %c0_42] : memref<10x18x8xbf16, #tpu.memory_space<vmem>>, vector<8x16x8xbf16>
    %30 = vector.shape_cast %29 : vector<8x16x8xbf16> to vector<128x8xbf16>
    %c0_43 = arith.constant 0 : index
    %c56 = arith.constant 56 : index
    %31 = vector.load %arg8[%c0_43, %c56] : memref<128x72xbf16, #tpu.memory_space<vmem>>, vector<128x8xbf16>
    tpu.vector_store %arg8[%c0_43, %c56], %30 {strides = array<i32>} : memref<128x72xbf16, #tpu.memory_space<vmem>>, vector<128x8xbf16>,
    %c2_44 = arith.constant 2 : index
    %c2_45 = arith.constant 2 : index
    %c0_46 = arith.constant 0 : index
    %32 = vector.load %arg7[%c2_44, %c2_45, %c0_46] : memref<10x18x8xbf16, #tpu.memory_space<vmem>>, vector<8x16x8xbf16>
    %33 = vector.shape_cast %32 : vector<8x16x8xbf16> to vector<128x8xbf16>
    %c0_47 = arith.constant 0 : index
    %c64 = arith.constant 64 : index
    %34 = vector.load %arg8[%c0_47, %c64] : memref<128x72xbf16, #tpu.memory_space<vmem>>, vector<128x8xbf16>
    tpu.vector_store %arg8[%c0_47, %c64], %33 {strides = array<i32>} : memref<128x72xbf16, #tpu.memory_space<vmem>>, vector<128x8xbf16>,
    %c0_48 = arith.constant 0 : index
    %c0_49 = arith.constant 0 : index
    %35 = vector.load %arg8[%c0_48, %c0_49] : memref<128x72xbf16, #tpu.memory_space<vmem>>, vector<128x72xbf16>
    %c0_50 = arith.constant 0 : index
    %c0_51 = arith.constant 0 : index
    %36 = vector.load %arg4[%c0_50, %c0_51] : memref<72x8xbf16, #tpu.memory_space<vmem>>, vector<72x8xbf16>
    %cst = arith.constant dense<0.000000e+00> : vector<128x8xf32>
    %37 = tpu.matmul %35, %36, %cst {dimension_numbers = #tpu.dot_dimension_numbers<[1], [0], [0], [1], [0, 0, 1, 1], [], []>} : vector<128x72xbf16>, vector<72x8xbf16>, vector<128x8xf32> -> vector<128x8xf32>
    %c0_52 = arith.constant 0 : index
    %c0_53 = arith.constant 0 : index
    %38 = vector.load %arg5[%c0_52, %c0_53] : memref<1x8xf32, #tpu.memory_space<vmem>>, vector<1x8xf32>
    %39 = vector.broadcast %38 : vector<1x8xf32> to vector<128x8xf32>
    %40 = arith.addf %37, %39 : vector<128x8xf32>
    %cst_54 = arith.constant 0.000000e+00 : f32
    %41 = vector.broadcast %cst_54 : f32 to vector<128x8xf32>
    %42 = arith.maximumf %40, %41 : vector<128x8xf32>
    %43 = vector.shape_cast %42 : vector<128x8xf32> to vector<8x16x8xf32>
    %c0_55 = arith.constant 0 : index
    %c0_56 = arith.constant 0 : index
    %c0_57 = arith.constant 0 : index
    %c0_58 = arith.constant 0 : index
    %44 = vector.load %arg6[%c0_55, %c0_56, %c0_57, %c0_58] : memref<1x8x16x8xf32, #tpu.memory_space<vmem>>, vector<1x8x16x8xf32>
    %45 = vector.shape_cast %44 : vector<1x8x16x8xf32> to vector<8x16x8xf32>
    %46 = vector.shape_cast %43 : vector<8x16x8xf32> to vector<1x8x16x8xf32>
    tpu.vector_store %arg6[%c0_55, %c0_56, %c0_57, %c0_58], %46 {strides = array<i32>} : memref<1x8x16x8xf32, #tpu.memory_space<vmem>>, vector<1x8x16x8xf32>,
    return
  }
  func.func @transform_0(%arg0: i32, %arg1: i32) -> (i32, i32, i32, i32) {
    %c0_i32 = arith.constant 0 : i32
    %c0_i32_0 = arith.constant 0 : i32
    %c0_i32_1 = arith.constant 0 : i32
    return %arg0, %arg1, %c0_i32, %c0_i32_0 : i32, i32, i32, i32
  }
  func.func @transform_1(%arg0: i32, %arg1: i32) -> (i32, i32, i32, i32) {
    %c1_i32 = arith.constant 1 : i32
    %0 = arith.addi %arg1, %c1_i32 : i32
    %c4_i32 = arith.constant 4 : i32
    %1 = arith.muli %0, %c4_i32 : i32
    %c0_i32 = arith.constant 0 : i32
    %c0_i32_0 = arith.constant 0 : i32
    %c0_i32_1 = arith.constant 0 : i32
    return %arg0, %1, %c0_i32, %c0_i32_0 : i32, i32, i32, i32
  }
  func.func @transform_2(%arg0: i32, %arg1: i32) -> (i32, i32) {
    %c0_i32 = arith.constant 0 : i32
    %c0_i32_0 = arith.constant 0 : i32
    %c0_i32_1 = arith.constant 0 : i32
    return %c0_i32, %c0_i32_0 : i32, i32
  }
  func.func @transform_3(%arg0: i32, %arg1: i32) -> (i32, i32) {
    %c0_i32 = arith.constant 0 : i32
    %c0_i32_0 = arith.constant 0 : i32
    %c0_i32_1 = arith.constant 0 : i32
    return %c0_i32, %c0_i32_0 : i32, i32
  }
  func.func @transform_4(%arg0: i32, %arg1: i32) -> (i32, i32, i32, i32) {
    %c0_i32 = arith.constant 0 : i32
    %c0_i32_0 = arith.constant 0 : i32
    %c0_i32_1 = arith.constant 0 : i32
    return %arg0, %arg1, %c0_i32, %c0_i32_0 : i32, i32, i32, i32
  }
}

</mosaic_0001>

<bundles_post_ra>
// kernel: tpu_custom_call.1
= control target key start
LH: loop header
LB: loop body
LE: loop exit
PB: predicated region body
PF: predicated region fallthrough
CT: control target
= control target key end

     0   :  { %s2797_s15 = smov 0   ;;  %s2799_s16 = smov 0   ;;  %s3558_s0 = inlined_call_operand.vmem [shape: f32[2,18,18,8], index: 0, kind: input, shape index: {}]   ;;  %s3559_s1 = inlined_call_operand.vmem [shape: f32[2,18,18,8], index: 1, kind: input, shape index: {}]   ;;  %s3560_s2 = inlined_call_operand.vmem [shape: bf16[72,8], index: 2, kind: input, shape index: {}]   ;;  %s3561_s3 = inlined_call_operand.vmem [shape: f32[1,8], index: 3, kind: input, shape index: {}]   ;;  %s3562_s4 = inlined_call_operand.vmem [shape: f32[2,16,16,8], index: 4, kind: output, shape index: {}]  }
   0x1   :  { %s2801_s17 = smov 0   ;;  %s2803_s18 = smov 0  }
   0x2   :  { %s2805_s19 = smov 0  }
   0x3 LB: > { %s23_s20 = sadd.s32 1, %s2754_s17  ;;  %s26_s21 = sadd.s32 1, %s2758_s18  ;;  %s2762_s19 = sphi %s2805_s19, %s14_s19   ;;  %s2758_s18 = sphi %s2803_s18, %s3571_s18   ;;  %s2754_s17 = sphi %s2801_s17, %s3570_s17   ;;  %s2750_s16 = sphi %s2799_s16, %s3569_s16   ;;  %s2746_s15 = sphi %s2797_s15, %s3568_s15  }
   0x4   : > { %p24_p0 = scmp.ge.s32.totalorder %s23_s20, 2  ;;  %p2482_p1 = scmp.ge.s32.totalorder %s2762_s19, 1 }
   0x5   : > { %p220_p2 = scmp.lt.s32.totalorder %s2762_s19, 5 }
   0x6   : > { %s3573_s20 = smov (%p24_p0, %s23_s20), 0  ;;  %s3575_s21 = smov (!%p24_p0, %s26_s21), %s2758_s18 }
   0x7   : > { %p221_p3 = pnand %p2482_p1, %p220_p2  ;;  %p28_p4 = scmp.ge.s32.totalorder %s3575_s21, 2 }
   0x8   : > { %s2827_s22 = sshll.u32 (!%p221_p3), %s2746_s15, 3  ;;  %p279_p5 = scmp.lt.s32.totalorder (!%p221_p3), %s2750_s16, 1 }
   0x9   : > { %s3577_s21 = smov (%p28_p4, %s3575_s21), 0  ;;  %224 = sbr.rel (%p221_p3) target bundleno = 621 (0x26d), region = 36 }
   0xa   : > { %p281_p6 = scmp.lt.s32.totalorder (!%p221_p3), %s2827_s22, 17  ;;  %s2764_s5 = smov (!%p221_p3), 16  }
   0xb   : > { %s2765_s6 = smov (!%p221_p3), 8   ;;  %s2766_s7 = smov (!%p221_p3), 24  }
   0xc   : > { %s2767_s8 = smov (!%p221_p3), 32   ;;  %s2608_s9 = sadd.s32 (!%p221_p3), 8, %s2827_s22 }
   0xd   : > { %p2987_p7 = scmp.lt.s32.totalorder (!%p221_p3), %s2608_s9, 17  ;;  %s2768_s11 = smov (!%p221_p3), 40  }
   0xe   : > { %s3579_s16 = smov (!%p279_p5, %s2750_s16), 1  ;;  %vm449_vm0 = vcmask 60416   ;;  %vm452_vm1 = vcmask 57344   ;;  %vm878_vm2 = vcmask 1042432   ;;  %vm879_vm3 = vcmask 1046532   ;;  %s2769_s15 = smov 48  }
   0xf   : > { %s282_s23 = scalar_select %p281_p6, %s2827_s22, 17  ;;  %vm2885_vm4 = vmor %vm878_vm2, %vm879_vm3  ;;  %vm570_vm5 = vsmask.f32 3328  ;;  %vm571_vm6 = vsmask.f32 7440  ;;  %vm2222_vm8 = vcmask 1043456  }
  0x10   : > { %s2661_s24 = smul.u32 54, %s3579_s16  ;;  %vm2917_vm7 = vmor %vm570_vm5, %vm571_vm6  ;;  %s3581_s9 = smov (!%p2987_p7, %s2608_s9), 17  ;;  %vm813_vm9 = vcmask 126016   ;;  %vm985_vm10 = vcmask 191616   ;;  %vm1083_vm11 = vcmask 257216   ;;  %vm1364_vm12 = vcmask 322816  }
  0x11   : > { %s2660_s25 = smul.u32 3, %s282_s23  ;;  %vm1533_vm13 = vcmask 388416   ;;  %vm1631_vm14 = vcmask 454016   ;;  %vm1912_vm15 = vcmask 519616   ;;  %p312_p8 = scmp.lt.s32.totalorder %s2827_s22, 15  ;;  %vm2339_vm2 = vcmask 64512  }
  0x12   : > { %s2662_s12 = smul.u32 3, %s3581_s9 }
  0x13   : > { %s285_s26 = sadd.s32 %s2661_s24, %s2660_s25  ;;  %s3583_s22 = smov (!%p312_p8, %s2827_s22), 15 }
  0x14   : > { %s2484_s27 = sshll.u32 %s285_s26, 3  ;;  %s303_s13 = sadd.s32 %s2662_s12, %s2661_s24 }
  0x15   : > { %s2839_s30 = scalar_lea.vmem %s3558_s0, %s2484_s27  ;;  %s2487_s14 = sshll.u32 %s303_s13, 3 }
  0x16   : > { %v321_v0 = vld [vmem:[%s2839_s30] sm:$0xff]  ;;  %v322_v1 = vld [vmem:[%s2839_s30 + $0x8] sm:$0xff]  ;;  %v323_v2 = vld [vmem:[%s2839_s30 + $0x10] sm:$0x3]  ;;  %s3026_s25 = scalar_lea.vmem %s3559_s1, %s2487_s14  ;;  %s2770_s26 = smov 56  }
  0x17   : > { %v2577_v3 = vpack.c.bf16 %v321_v0, %v321_v0  ;;  %v2578_v4 = vpack.c.bf16 %v322_v1, %v322_v1  ;;  %v2579_v5 = vpack.c.bf16 %v323_v2, %v323_v2  ;;  %v333_v6 = vld [vmem:[%s2839_s30 + $0x60] sm:$0xff]  ;;  %v334_v7 = vld [vmem:[%s2839_s30 + $0x68] sm:$0xff]  ;;  %v335_v8 = vld [vmem:[%s2839_s30 + $0x70] sm:$0x3]  ;;  %s2771_s27 = smov 64  }
  0x18   : > { %v2589_v9 = vpack.c.bf16 %v333_v6, %v333_v6  ;;  %v2590_v10 = vpack.c.bf16 %v334_v7, %v334_v7  ;;  %v2591_v11 = vpack.c.bf16 %v335_v8, %v335_v8  ;;  %v324_v12 = vld [vmem:[%s2839_s30 + $0x18] sm:$0xff]  ;;  %v325_v13 = vld [vmem:[%s2839_s30 + $0x20] sm:$0xff]  ;;  %v326_v14 = vld [vmem:[%s2839_s30 + $0x28] sm:$0x3] }
  0x19   : > { %450 = vst.msk [vmem:[#allocation2] sm:$0xf] %vm449_vm0, %v2577_v3  ;;  %451 = vst.msk [vmem:[#allocation2 + $0x4] sm:$0xf] %vm449_vm0, %v2578_v4  ;;  %v2580_v15 = vpack.c.bf16 %v324_v12, %v324_v12  ;;  %v2581_v16 = vpack.c.bf16 %v325_v13, %v325_v13  ;;  %v2582_v17 = vpack.c.bf16 %v326_v14, %v326_v14  ;;  %v336_v18 = vld [vmem:[%s2839_s30 + $0x78] sm:$0xff]  ;;  %v337_v19 = vld [vmem:[%s2839_s30 + $0x80] sm:$0xff] }
  0x1a   : > { %453 = vst.msk [vmem:[#allocation2 + $0x8] sm:$0x1] %vm452_vm1, %v2579_v5  ;;  %v338_v20 = vld [vmem:[%s2839_s30 + $0x88] sm:$0x3]  ;;  %465 = vst.msk [vmem:[#allocation2 + $0x38] sm:$0x1] %vm452_vm1, %v2591_v11  ;;  %v2592_v21 = vpack.c.bf16 %v336_v18, %v336_v18  ;;  %v2593_v22 = vpack.c.bf16 %v337_v19, %v337_v19 }
  0x1b   : > { %463 = vst.msk [vmem:[#allocation2 + $0x30] sm:$0xf] %vm449_vm0, %v2589_v9  ;;  %464 = vst.msk [vmem:[#allocation2 + $0x34] sm:$0xf] %vm449_vm0, %v2590_v10  ;;  %v2594_v23 = vpack.c.bf16 %v338_v20, %v338_v20  ;;  %v328_v24 = vld [vmem:[%s2839_s30 + $0x38] sm:$0xff]  ;;  %v327_v25 = vld [vmem:[%s2839_s30 + $0x30] sm:$0xff] }
  0x1c   : > { %v340_v26 = vld [vmem:[%s2839_s30 + $0x98] sm:$0xff]  ;;  %454 = vst.msk [vmem:[#allocation2 + $0xc] sm:$0xf] %vm449_vm0, %v2580_v15  ;;  %455 = vst.msk [vmem:[#allocation2 + $0x10] sm:$0xf] %vm449_vm0, %v2581_v16  ;;  %v2584_v27 = vpack.c.bf16 %v328_v24, %v328_v24  ;;  %v2583_v28 = vpack.c.bf16 %v327_v25, %v327_v25  ;;  %v339_v30 = vld [vmem:[%s2839_s30 + $0x90] sm:$0xff] }
  0x1d   : > { %456 = vst.msk [vmem:[#allocation2 + $0x14] sm:$0x1] %vm452_vm1, %v2582_v17  ;;  %v2596_v29 = vpack.c.bf16 %v340_v26, %v340_v26  ;;  %v329_v31 = vld [vmem:[%s2839_s30 + $0x40] sm:$0x3]  ;;  %468 = vst.msk [vmem:[#allocation2 + $0x44] sm:$0x1] %vm452_vm1, %v2594_v23  ;;  %v2595_v33 = vpack.c.bf16 %v339_v30, %v339_v30 }
  0x1e   : > { %v341_v32 = vld [vmem:[%s2839_s30 + $0xa0] sm:$0x3]  ;;  %466 = vst.msk [vmem:[#allocation2 + $0x3c] sm:$0xf] %vm449_vm0, %v2592_v21  ;;  %467 = vst.msk [vmem:[#allocation2 + $0x40] sm:$0xf] %vm449_vm0, %v2593_v22  ;;  %v2585_v34 = vpack.c.bf16 %v329_v31, %v329_v31 }
  0x1f   : > { %v2597_v35 = vpack.c.bf16 %v341_v32, %v341_v32  ;;  %v331_v36 = vld [vmem:[%s2839_s30 + $0x50] sm:$0xff]  ;;  %v330_v37 = vld [vmem:[%s2839_s30 + $0x48] sm:$0xff]  ;;  %458 = vst.msk [vmem:[#allocation2 + $0x1c] sm:$0xf] %vm449_vm0, %v2584_v27  ;;  %457 = vst.msk [vmem:[#allocation2 + $0x18] sm:$0xf] %vm449_vm0, %v2583_v28 }
  0x20   : > { %v343_v38 = vld [vmem:[%s2839_s30 + $0xb0] sm:$0xff]  ;;  %470 = vst.msk [vmem:[#allocation2 + $0x4c] sm:$0xf] %vm449_vm0, %v2596_v29  ;;  %v2587_v39 = vpack.c.bf16 %v331_v36, %v331_v36  ;;  %v2586_v40 = vpack.c.bf16 %v330_v37, %v330_v37  ;;  %v342_v42 = vld [vmem:[%s2839_s30 + $0xa8] sm:$0xff]  ;;  %v332_v43 = vld [vmem:[%s2839_s30 + $0x58] sm:$0x3] }
  0x21   : > { %v2599_v41 = vpack.c.bf16 %v343_v38, %v343_v38  ;;  %v344_v44 = vld [vmem:[%s2839_s30 + $0xb8] sm:$0x3]  ;;  %469 = vst.msk [vmem:[#allocation2 + $0x48] sm:$0xf] %vm449_vm0, %v2595_v33  ;;  %v2598_v45 = vpack.c.bf16 %v342_v42, %v342_v42  ;;  %v2588_v46 = vpack.c.bf16 %v332_v43, %v332_v43  ;;  %v830_v49 = vld [vmem:[#allocation2] sm:$0xe] }
  0x22   : > { %459 = vst.msk [vmem:[#allocation2 + $0x20] sm:$0x1] %vm452_vm1, %v2585_v34  ;;  %471 = vst.msk [vmem:[#allocation2 + $0x50] sm:$0x1] %vm452_vm1, %v2597_v35  ;;  %v2600_v47 = vpack.c.bf16 %v344_v44, %v344_v44  ;;  %v831_v50 = vld [vmem:[#allocation2 + $0x4] sm:$0xf] }
  0x23   : > { %461 = vst.msk [vmem:[#allocation2 + $0x28] sm:$0xf] %vm449_vm0, %v2587_v39  ;;  %460 = vst.msk [vmem:[#allocation2 + $0x24] sm:$0xf] %vm449_vm0, %v2586_v40  ;;  %v832_v51 = vld [vmem:[#allocation2 + $0x8] sm:$0x1] }
  0x24   : > { %473 = vst.msk [vmem:[#allocation2 + $0x58] sm:$0xf] %vm449_vm0, %v2599_v41  ;;  %472 = vst.msk [vmem:[#allocation2 + $0x54] sm:$0xf] %vm449_vm0, %v2598_v45  ;;  %v2522_v52 = vrot.slane %v830_v49, 9  ;;  %v883_v53 = vrot.slane %v831_v50, 5 }
  0x25   : > { %462 = vst.msk [vmem:[#allocation2 + $0x2c] sm:$0x1] %vm452_vm1, %v2588_v46  ;;  %474 = vst.msk [vmem:[#allocation2 + $0x5c] sm:$0x1] %vm452_vm1, %v2600_v47  ;;  %v886_v54 = vrot.slane %v832_v51, 5 }
  0x26   : > { %v842_v55 = vld [vmem:[#allocation2 + $0x30] sm:$0xe]  ;;  %v843_v56 = vld [vmem:[#allocation2 + $0x34] sm:$0xf]  ;;  %v844_v58 = vld [vmem:[#allocation2 + $0x38] sm:$0x1]  ;;  %v884_v59 = vsel %vm2885_vm4, %v2522_v52, %v883_v53 }
  0x27   : > { %v2526_v57 = vrot.slane %v842_v55, 9  ;;  %v885_v60 = vrot.slane %v883_v53, 4  ;;  %v911_v61 = vrot.slane %v843_v56, 5  ;;  %v914_v62 = vrot.slane %v844_v58, 5  ;;  %v833_v63 = vld [vmem:[#allocation2 + $0xc] sm:$0xe]  ;;  %937 = vrot.lane.b32.xlu0 %v884_v59, %s2764_s5 }
  0x28   : > { %v834_v0 = vld [vmem:[#allocation2 + $0x10] sm:$0xf]  ;;  %v2523_v1 = vrot.slane %v833_v63, 9  ;;  %v835_v2 = vld [vmem:[#allocation2 + $0x14] sm:$0x1] }
  0x29   : > { %v887_v3 = vsel %vm2885_vm4, %v885_v60, %v886_v54  ;;  %v912_v4 = vsel %vm2885_vm4, %v2526_v57, %v911_v61  ;;  %v913_v5 = vrot.slane %v911_v61, 4  ;;  %v890_v6 = vrot.slane %v834_v0, 5  ;;  %v845_v7 = vld [vmem:[#allocation2 + $0x3c] sm:$0xe]  ;;  %v846_v8 = vld [vmem:[#allocation2 + $0x40] sm:$0xf] }
  0x2a   : > { %939 = vrot.lane.b32.xlu1 %v887_v3, %s2764_s5  ;;  %v893_v9 = vrot.slane %v835_v2, 5  ;;  %v918_v10 = vrot.slane %v846_v8, 5  ;;  %v847_v11 = vld [vmem:[#allocation2 + $0x44] sm:$0x1]  ;;  %v2527_v14 = vrot.slane %v845_v7, 9 }
  0x2b   : > { %v915_v12 = vsel %vm2885_vm4, %v913_v5, %v914_v62  ;;  %v892_v13 = vrot.slane %v890_v6, 4  ;;  %v546_v15 = vld [vmem:[#allocation2] sm:$0xf]  ;;  %v547_v16 = vld [vmem:[#allocation2 + $0x4] sm:$0xf]  ;;  %953 = vrot.lane.b32.xlu0 %v912_v4, %s2764_s5  ;;  %v891_v17 = vsel %vm2885_vm4, %v2523_v1, %v890_v6  ;;  %v921_v18 = vrot.slane %v847_v11, 5 }
  0x2c   : > { %v574_v19 = vshrl.u32 %v546_v15, 16  ;;  %v577_v20 = vshll.u32 %v546_v15, 16  ;;  %v558_v21 = vld [vmem:[#allocation2 + $0x30] sm:$0xf]  ;;  %v920_v22 = vrot.slane %v918_v10, 4  ;;  %v583_v23 = vshll.u32 %v547_v16, 16 }
  0x2d   : > { %v587_v24 = vshrl.u32 %v547_v16, 16  ;;  %v559_v25 = vld [vmem:[#allocation2 + $0x34] sm:$0xf]  ;;  %v670_v26 = vshrl.u32 %v558_v21, 16  ;;  %v894_v27 = vsel %vm2885_vm4, %v892_v13, %v893_v9  ;;  %v673_v30 = vshll.u32 %v558_v21, 16 }
  0x2e   : > { %955 = vrot.lane.b32.xlu1 %v915_v12, %s2764_s5  ;;  %v576_v28 = vrot.slane %v574_v19, 4  ;;  %v579_v29 = vrot.slane %v577_v20, 5  ;;  %v548_v31 = vld [vmem:[#allocation2 + $0x8] sm:$0x1]  ;;  %v585_v32 = vrot.slane %v583_v23, 5  ;;  %v679_v34 = vshll.u32 %v559_v25, 16 }
  0x2f   : > { %v672_v33 = vrot.slane %v670_v26, 4  ;;  %v683_v35 = vshrl.u32 %v559_v25, 16  ;;  %v560_v36 = vld [vmem:[#allocation2 + $0x38] sm:$0x1]  ;;  %941 = vrot.lane.b32.xlu0 %v891_v17, %s2764_s5  ;;  %v675_v38 = vrot.slane %v673_v30, 5  ;;  %v589_v39 = vrot.slane %v587_v24, 4 }
  0x30   : > { %v580_v37 = vor.u32 %v579_v29, %v576_v28  ;;  %v593_v40 = vshll.u32 %v548_v31, 16  ;;  %v549_v41 = vld [vmem:[#allocation2 + $0xc] sm:$0xf]  ;;  %v919_v42 = vsel %vm2885_vm4, %v2527_v14, %v918_v10  ;;  %v681_v43 = vrot.slane %v679_v34, 5  ;;  %v550_v45 = vld [vmem:[#allocation2 + $0x10] sm:$0xf] }
  0x31   : > { %v685_v44 = vrot.slane %v683_v35, 4  ;;  %v598_v46 = vshrl.u32 %v549_v41, 16  ;;  %v676_v50 = vor.u32 %v675_v38, %v672_v33  ;;  %v590_v51 = vor.u32 %v589_v39, %v585_v32  ;;  %v561_v57 = vld [vmem:[#allocation2 + $0x3c] sm:$0xf]  ;;  %v551_v61 = vld [vmem:[#allocation2 + $0x14] sm:$0x1] }
  0x32   : > { %943 = vrot.lane.b32.xlu1 %v894_v27, %s2764_s5  ;;  %v581_v49 = vrot.slane %v580_v37, 4  ;;  %v689_v52 = vshll.u32 %v560_v36, 16  ;;  %v922_v53 = vsel %vm2885_vm4, %v920_v22, %v921_v18  ;;  %v601_v56 = vshll.u32 %v549_v41, 16  ;;  %v562_v2 = vld [vmem:[#allocation2 + $0x40] sm:$0xf] }
  0x33   : > { %v686_v54 = vor.u32 %v685_v44, %v681_v43  ;;  %v600_v55 = vrot.slane %v598_v46, 4  ;;  %957 = vrot.lane.b32.xlu0 %v919_v42, %s2764_s5  ;;  %v677_v58 = vrot.slane %v676_v50, 4  ;;  %v595_v59 = vrot.slane %v593_v40, 5  ;;  %v563_v15 = vld [vmem:[#allocation2 + $0x44] sm:$0x1] }
  0x34   : > { %v607_v60 = vshll.u32 %v550_v45, 16  ;;  %v586_v62 = vsel %vm2917_vm7, %v581_v49, %v585_v32  ;;  %v591_v63 = vrot.slane %v590_v51, 4  ;;  %v603_v0 = vrot.slane %v601_v56, 5  ;;  %v1100_v34 = vld [vmem:[#allocation2 + $0xc] sm:$0xf] }
  0x35   : > { %v611_v1 = vshrl.u32 %v550_v45, 16  ;;  %v687_v3 = vrot.slane %v686_v54, 4  ;;  %v691_v4 = vrot.slane %v689_v52, 5  ;;  %v694_v6 = vshrl.u32 %v561_v57, 16  ;;  %v1101_v36 = vld [vmem:[#allocation2 + $0x10] sm:$0xf] }
  0x36   : > { %959 = vrot.lane.b32.xlu1 %v922_v53, %s2764_s5  ;;  %v609_v5 = vrot.slane %v607_v60, 5  ;;  %v682_v7 = vsel %vm2917_vm7, %v677_v58, %v681_v43  ;;  %v604_v8 = vor.u32 %v603_v0, %v600_v55  ;;  %v617_v10 = vshll.u32 %v551_v61, 16  ;;  %v1003_v39 = vld [vmem:[#allocation2 + $0xc] sm:$0xf]  ;;  %v1112_v40 = vld [vmem:[#allocation2 + $0x3c] sm:$0xf] }
  0x37   : > { %v613_v9 = vrot.slane %v611_v1, 4  ;;  %765 = vrot.lane.b32.xlu0 %v586_v62, %s2765_s6  ;;  %v696_v11 = vrot.slane %v694_v6, 4  ;;  %v697_v12 = vshll.u32 %v561_v57, 16  ;;  %v703_v13 = vshll.u32 %v562_v2, 16  ;;  %v1004_v43 = vld [vmem:[#allocation2 + $0x10] sm:$0xf] }
  0x38   : > { %v707_v14 = vshrl.u32 %v562_v2, 16  ;;  %v596_v16 = vsel %vm2917_vm7, %v591_v63, %v595_v59  ;;  %v605_v17 = vrot.slane %v604_v8, 4  ;;  %v692_v22 = vsel %vm2917_vm7, %v687_v3, %v691_v4  ;;  %v1113_v44 = vld [vmem:[#allocation2 + $0x40] sm:$0xf]  ;;  %v1011_v51 = vld [vmem:[#allocation2 + $0x3c] sm:$0xf] }
  0x39   : > { %v614_v18 = vor.u32 %v613_v9, %v609_v5  ;;  %v699_v19 = vrot.slane %v697_v12, 5  ;;  %v705_v20 = vrot.slane %v703_v13, 5  ;;  %v619_v24 = vrot.slane %v617_v10, 5  ;;  %v1103_v56 = vld [vmem:[#allocation2 + $0x18] sm:$0xf] }
  0x3a   : > { %781 = vrot.lane.b32.xlu1 %v682_v7, %s2765_s6  ;;  %v709_v21 = vrot.slane %v707_v14, 4  ;;  %v713_v25 = vshll.u32 %v563_v15, 16  ;;  %v610_v28 = vsel %vm2917_vm7, %v605_v17, %v609_v5  ;;  %v1125_v37 = vshrl.u32 %v1100_v34, 16  ;;  %v1012_v57 = vld [vmem:[#allocation2 + $0x40] sm:$0xf] }
  0x3b   : > { %v615_v23 = vrot.slane %v614_v18, 4  ;;  %767 = vrot.lane.b32.xlu0 %v596_v16, %s2765_s6  ;;  %v700_v26 = vor.u32 %v699_v19, %v696_v11  ;;  %v1128_v38 = vshll.u32 %v1100_v34, 16  ;;  %v1134_v41 = vshll.u32 %v1101_v36, 16  ;;  %v1102_v58 = vld [vmem:[#allocation2 + $0x14] sm:$0x1] }
  0x3c   : > { %v710_v27 = vor.u32 %v709_v21, %v705_v20  ;;  %v715_v32 = vrot.slane %v713_v25, 5  ;;  %v1138_v42 = vshrl.u32 %v1101_v36, 16  ;;  %v1127_v45 = vrot.slane %v1125_v37, 4  ;;  %v1104_v62 = vld [vmem:[#allocation2 + $0x1c] sm:$0xf] }
  0x3d   : > { %v701_v29 = vrot.slane %v700_v26, 4  ;;  %v620_v30 = vsel %vm2917_vm7, %v615_v23, %v619_v24  ;;  %v1130_v46 = vrot.slane %v1128_v38, 5  ;;  %v1221_v49 = vshrl.u32 %v1112_v40, 16  ;;  %v1005_v63 = vld [vmem:[#allocation2 + $0x18] sm:$0xf] }
  0x3e   : > { %783 = vrot.lane.b32.xlu1 %v692_v22, %s2765_s6  ;;  %v711_v31 = vrot.slane %v710_v27, 4  ;;  %v1224_v50 = vshll.u32 %v1112_v40, 16  ;;  %v1136_v52 = vrot.slane %v1134_v41, 5  ;;  %v1140_v53 = vrot.slane %v1138_v42, 4  ;;  %v1115_v6 = vld [vmem:[#allocation2 + $0x48] sm:$0xf] }
  0x3f   : > { %769 = vrot.lane.b32.xlu0 %v610_v28, %s2765_s6  ;;  %v706_v33 = vsel %vm2917_vm7, %v701_v29, %v705_v20  ;;  %v1230_v54 = vshll.u32 %v1113_v44, 16  ;;  %v1234_v55 = vshrl.u32 %v1113_v44, 16  ;;  %v1131_v59 = vor.u32 %v1130_v46, %v1127_v45  ;;  %v1006_v7 = vld [vmem:[#allocation2 + $0x1c] sm:$0xf]  ;;  %v1114_v8 = vld [vmem:[#allocation2 + $0x44] sm:$0x1] }
  0x40   : > { %v716_v35 = vsel %vm2917_vm7, %v711_v31, %v715_v32  ;;  %v1223_v60 = vrot.slane %v1221_v49, 4  ;;  %v1226_v61 = vrot.slane %v1224_v50, 5  ;;  %v1149_v0 = vshrl.u32 %v1103_v56, 16  ;;  %v1116_v13 = vld [vmem:[#allocation2 + $0x4c] sm:$0xf] }
  0x41   : > { %v1152_v1 = vshll.u32 %v1103_v56, 16  ;;  %v1141_v2 = vor.u32 %v1140_v53, %v1136_v52  ;;  %v1144_v3 = vshll.u32 %v1102_v58, 16  ;;  %v1232_v4 = vrot.slane %v1230_v54, 5  ;;  %v1013_v14 = vld [vmem:[#allocation2 + $0x48] sm:$0xf] }
  0x42   : > { %771 = vrot.lane.b32.xlu1 %v620_v30, %s2765_s6  ;;  %v1236_v5 = vrot.slane %v1234_v55, 4  ;;  %v1158_v9 = vshll.u32 %v1104_v62, 16  ;;  %v1162_v10 = vshrl.u32 %v1104_v62, 16  ;;  %v1132_v11 = vrot.slane %v1131_v59, 4  ;;  %v1014_v19 = vld [vmem:[#allocation2 + $0x4c] sm:$0xf] }
  0x43   : > { %785 = vrot.lane.b32.xlu0 %v706_v33, %s2765_s6  ;;  %v1227_v12 = vor.u32 %v1226_v61, %v1223_v60  ;;  %v1151_v15 = vrot.slane %v1149_v0, 4  ;;  %v1154_v16 = vrot.slane %v1152_v1, 5  ;;  %v1245_v17 = vshrl.u32 %v1115_v6, 16  ;;  %v1105_v24 = vld [vmem:[#allocation2 + $0x20] sm:$0x1] }
  0x44   : > { %v1248_v18 = vshll.u32 %v1115_v6, 16  ;;  %v1142_v20 = vrot.slane %v1141_v2, 4  ;;  %v1146_v21 = vrot.slane %v1144_v3, 5  ;;  %v1237_v22 = vor.u32 %v1236_v5, %v1232_v4  ;;  %v1117_v41 = vld [vmem:[#allocation2 + $0x50] sm:$0x1] }
  0x45   : > { %v1240_v23 = vshll.u32 %v1114_v8, 16  ;;  %v1160_v25 = vrot.slane %v1158_v9, 5  ;;  %v1164_v26 = vrot.slane %v1162_v10, 4  ;;  %v1254_v27 = vshll.u32 %v1116_v13, 16  ;;  %v1381_v55 = vld [vmem:[#allocation2 + $0xc] sm:$0xe] }
  0x46   : > { %787 = vrot.lane.b32.xlu1 %v716_v35, %s2765_s6  ;;  %v1258_v28 = vshrl.u32 %v1116_v13, 16  ;;  %v1137_v29 = vsel %vm2917_vm7, %v1132_v11, %v1136_v52  ;;  %v1228_v30 = vrot.slane %v1227_v12, 4  ;;  %v1155_v31 = vor.u32 %v1154_v16, %v1151_v15  ;;  %v1382_v52 = vld [vmem:[#allocation2 + $0x10] sm:$0xf]  ;;  %v1383_v60 = vld [vmem:[#allocation2 + $0x14] sm:$0x1] }
  0x47   : > { %1035 = vrot.lane.b32.xlu0 %v1003_v39, %s2766_s7  ;;  %v1247_v32 = vrot.slane %v1245_v17, 4  ;;  %v1250_v33 = vrot.slane %v1248_v18, 5  ;;  %v1147_v34 = vsel %vm2917_vm7, %v1142_v20, %v1146_v21  ;;  %v1242_v35 = vrot.slane %v1240_v23, 5  ;;  %v1394_v61 = vld [vmem:[#allocation2 + $0x40] sm:$0xf] }
  0x48   : > { %v1168_v36 = vshll.u32 %v1105_v24, 16  ;;  %v1238_v37 = vrot.slane %v1237_v22, 4  ;;  %v1165_v38 = vor.u32 %v1164_v26, %v1160_v25  ;;  %v1256_v39 = vrot.slane %v1254_v27, 5  ;;  %v1393_v0 = vld [vmem:[#allocation2 + $0x3c] sm:$0xe] }
  0x49   : > { %v1260_v40 = vrot.slane %v1258_v28, 4  ;;  %v1233_v42 = vsel %vm2917_vm7, %v1228_v30, %v1232_v4  ;;  %v1251_v44 = vor.u32 %v1250_v33, %v1247_v32  ;;  %v1431_v59 = vrot.slane %v1382_v52, 5  ;;  %v1395_v5 = vld [vmem:[#allocation2 + $0x44] sm:$0x1]  ;;  %v1385_v6 = vld [vmem:[#allocation2 + $0x1c] sm:$0xf] }
  0x4a   : > { %1037 = vrot.lane.b32.xlu1 %v1004_v43, %s2766_s7  ;;  %v1156_v43 = vrot.slane %v1155_v31, 4  ;;  %v1170_v45 = vrot.slane %v1168_v36, 5  ;;  %v1243_v46 = vsel %vm2917_vm7, %v1238_v37, %v1242_v35  ;;  %v1166_v49 = vrot.slane %v1165_v38, 4  ;;  %v1384_v9 = vld [vmem:[#allocation2 + $0x18] sm:$0xe] }
  0x4b   : > { %1051 = vrot.lane.b32.xlu0 %v1011_v51, %s2766_s7  ;;  %v1261_v50 = vor.u32 %v1260_v40, %v1256_v39  ;;  %v1264_v51 = vshll.u32 %v1117_v41, 16  ;;  %v1252_v54 = vrot.slane %v1251_v44, 4  ;;  %v1433_v2 = vrot.slane %v1431_v59, 4  ;;  %v514_v10 = vld [vmem:[#allocation2] sm:$0xf] }
  0x4c   : > { %v1161_v53 = vsel %vm2917_vm7, %v1156_v43, %v1160_v25  ;;  %v1171_v56 = vsel %vm2917_vm7, %v1166_v49, %v1170_v45  ;;  %v1434_v3 = vrot.slane %v1383_v60, 5  ;;  %v1459_v4 = vrot.slane %v1394_v61, 5  ;;  %530 = vst.msk [vmem:[#allocation3] sm:$0xf] %vm449_vm0, %v514_v10  ;;  %v522_v15 = vld [vmem:[#allocation2 + $0x30] sm:$0xf] }
  0x4d   : > { %v1266_v58 = vrot.slane %v1264_v51, 5  ;;  %v1257_v62 = vsel %vm2917_vm7, %v1252_v54, %v1256_v39  ;;  %v2534_v8 = vrot.slane %v1393_v0, 9  ;;  %v1462_v13 = vrot.slane %v1395_v5, 5  ;;  %v1386_v16 = vld [vmem:[#allocation2 + $0x20] sm:$0x1] }
  0x4e   : > { %1053 = vrot.lane.b32.xlu1 %v1012_v57, %s2766_s7  ;;  %v1262_v57 = vrot.slane %v1261_v50, 4  ;;  %v1435_v11 = vsel %vm2885_vm4, %v1433_v2, %v1434_v3  ;;  %v1461_v12 = vrot.slane %v1459_v4, 4  ;;  %v1397_v17 = vld [vmem:[#allocation2 + $0x4c] sm:$0xf]  ;;  %538 = vst.msk [vmem:[#allocation3 + $0x20] sm:$0xf] %vm449_vm0, %v522_v15 }
  0x4f   : > { %1039 = vrot.lane.b32.xlu0 %v1005_v63, %s2766_s7  ;;  %v2530_v63 = vrot.slane %v1381_v55, 9  ;;  %v1460_v18 = vsel %vm2885_vm4, %v2534_v8, %v1459_v4  ;;  %v1396_v20 = vld [vmem:[#allocation2 + $0x48] sm:$0xe]  ;;  %v1441_v23 = vrot.slane %v1386_v16, 5  ;;  %v1466_v24 = vrot.slane %v1397_v17, 5  ;;  %v475_v4 = vld [vmem:[%s3026_s25] sm:$0xff] }
  0x50   : > { %v1267_v1 = vsel %vm2917_vm7, %v1262_v57, %v1266_v58  ;;  %v1463_v21 = vsel %vm2885_vm4, %v1461_v12, %v1462_v13  ;;  %v515_v25 = vld [vmem:[#allocation2 + $0x4] sm:$0xf]  ;;  %v1398_v26 = vld [vmem:[#allocation2 + $0x50] sm:$0x1]  ;;  %v523_v27 = vld [vmem:[#allocation2 + $0x34] sm:$0xf] }
  0x51   : > { %531 = vst.msk [vmem:[#allocation3 + $0x4] sm:$0xf] %vm449_vm0, %v515_v25  ;;  %539 = vst.msk [vmem:[#allocation3 + $0x24] sm:$0xf] %vm449_vm0, %v523_v27  ;;  %v1468_v31 = vrot.slane %v1466_v24, 4  ;;  %v1469_v32 = vrot.slane %v1398_v26, 5 }
  0x52   : > { %1041 = vrot.lane.b32.xlu1 %v1006_v7, %s2766_s7  ;;  %v1432_v7 = vsel %vm2885_vm4, %v2530_v63, %v1431_v59  ;;  %v516_v33 = vld [vmem:[#allocation2 + $0xc] sm:$0xf]  ;;  %v517_v35 = vld [vmem:[#allocation2 + $0x10] sm:$0xf]  ;;  %v1649_v38 = vld [vmem:[#allocation2 + $0x1c] sm:$0xf] }
  0x53   : > { %1055 = vrot.lane.b32.xlu0 %v1013_v14, %s2766_s7  ;;  %v1438_v14 = vrot.slane %v1385_v6, 5  ;;  %532 = vst.msk [vmem:[#allocation3 + $0x8] sm:$0xf] %vm449_vm0, %v516_v33  ;;  %533 = vst.msk [vmem:[#allocation3 + $0xc] sm:$0xf] %vm449_vm0, %v517_v35  ;;  %v1470_v37 = vsel %vm2885_vm4, %v1468_v31, %v1469_v32  ;;  %v1682_v45 = vshll.u32 %v1649_v38, 16 }
  0x54   : > { %v524_v41 = vld [vmem:[#allocation2 + $0x3c] sm:$0xf]  ;;  %v1551_v43 = vld [vmem:[#allocation2 + $0x18] sm:$0xf]  ;;  %v1660_v44 = vld [vmem:[#allocation2 + $0x48] sm:$0xf] }
  0x55   : > { %v1440_v22 = vrot.slane %v1438_v14, 4  ;;  %540 = vst.msk [vmem:[#allocation3 + $0x28] sm:$0xf] %vm449_vm0, %v524_v41  ;;  %v1552_v49 = vld [vmem:[#allocation2 + $0x1c] sm:$0xf]  ;;  %v1772_v55 = vshll.u32 %v1660_v44, 16 }
  0x56   : > { %1057 = vrot.lane.b32.xlu1 %v1014_v19, %s2766_s7  ;;  %v2531_v19 = vrot.slane %v1384_v9, 9  ;;  %v1661_v52 = vld [vmem:[#allocation2 + $0x4c] sm:$0xf]  ;;  %v1559_v54 = vld [vmem:[#allocation2 + $0x48] sm:$0xf]  ;;  %v3029_v57 = vrot.slane %v1682_v45, 5 }
  0x57   : > { %1316 = vrot.lane.b32.xlu0 %v1137_v29, %s2767_s8  ;;  %v2535_v29 = vrot.slane %v1396_v20, 9  ;;  %v1442_v30 = vsel %vm2885_vm4, %v1440_v22, %v1441_v23  ;;  %v1651_v59 = vld [vmem:[#allocation2 + $0x24] sm:$0xf]  ;;  %v1650_v60 = vld [vmem:[#allocation2 + $0x20] sm:$0x1]  ;;  %v1782_v63 = vshrl.u32 %v1661_v52, 16 }
  0x58   : > { %v1439_v28 = vsel %vm2885_vm4, %v2531_v19, %v1438_v14  ;;  %v1652_v0 = vld [vmem:[#allocation2 + $0x28] sm:$0xf]  ;;  %v1774_v5 = vrot.slane %v1772_v55, 5  ;;  %v1697_v6 = vshrl.u32 %v1651_v59, 16  ;;  %v1663_v8 = vld [vmem:[#allocation2 + $0x54] sm:$0xf] }
  0x59   : > { %v1467_v36 = vsel %vm2885_vm4, %v2535_v29, %v1466_v24  ;;  %v476_v3 = vld [vmem:[%s3026_s25 + $0x8] sm:$0xff]  ;;  %v479_v9 = vld [vmem:[%s3026_s25 + $0x20] sm:$0xff]  ;;  %v1692_v12 = vshll.u32 %v1650_v60, 16  ;;  %v1706_v13 = vshll.u32 %v1652_v0, 16  ;;  %v1710_v14 = vshrl.u32 %v1652_v0, 16  ;;  %v478_v15 = vld [vmem:[%s3026_s25 + $0x18] sm:$0xff] }
  0x5a   : > { %1318 = vrot.lane.b32.xlu1 %v1147_v34, %s2767_s8  ;;  %v1648_v34 = vld [vmem:[#allocation2 + $0x18] sm:$0xf]  ;;  %v1554_v10 = vld [vmem:[#allocation2 + $0x28] sm:$0xf]  ;;  %v1662_v17 = vld [vmem:[#allocation2 + $0x50] sm:$0x1]  ;;  %v2602_v20 = vpack.c.bf16 %v476_v3, %v476_v3  ;;  %v2601_v24 = vpack.c.bf16 %v475_v4, %v475_v4  ;;  %v2605_v25 = vpack.c.bf16 %v479_v9, %v479_v9 }
  0x5b   : > { %1332 = vrot.lane.b32.xlu0 %v1233_v42, %s2767_s8  ;;  %v1673_v39 = vshrl.u32 %v1648_v34, 16  ;;  %v1676_v40 = vshll.u32 %v1648_v34, 16  ;;  %v525_v42 = vld [vmem:[#allocation2 + $0x40] sm:$0xf]  ;;  %v1784_v19 = vrot.slane %v1782_v63, 4  ;;  %v1793_v22 = vshrl.u32 %v1663_v8, 16 }
  0x5c   : > { %541 = vst.msk [vmem:[#allocation3 + $0x2c] sm:$0xf] %vm449_vm0, %v525_v42  ;;  %v1796_v23 = vshll.u32 %v1663_v8, 16  ;;  %v1561_v26 = vld [vmem:[#allocation2 + $0x54] sm:$0xf]  ;;  %v1694_v32 = vrot.slane %v1692_v12, 5 }
  0x5d   : > { %v1675_v50 = vrot.slane %v1673_v39, 4  ;;  %v1678_v51 = vrot.slane %v1676_v40, 5  ;;  %509 = vst.msk [vmem:[#allocation2 + $0x64] sm:$0xf] %vm449_vm0, %v2602_v20  ;;  %v1562_v31 = vld [vmem:[#allocation2 + $0x58] sm:$0xf] }
  0x5e   : > { %1334 = vrot.lane.b32.xlu1 %v1243_v46, %s2767_s8  ;;  %v1686_v46 = vshrl.u32 %v1649_v38, 16  ;;  %v1788_v33 = vshll.u32 %v1662_v17, 16  ;;  %v1708_v34 = vrot.slane %v1706_v13, 5  ;;  %v1712_v35 = vrot.slane %v1710_v14, 4  ;;  %508 = vst.msk [vmem:[#allocation2 + $0x60] sm:$0xf] %vm449_vm0, %v2601_v24 }
  0x5f   : > { %1320 = vrot.lane.b32.xlu0 %v1161_v53, %s2767_s8  ;;  %v1769_v53 = vshrl.u32 %v1660_v44, 16  ;;  %v1679_v61 = vor.u32 %v1678_v51, %v1675_v50  ;;  %512 = vst.msk [vmem:[#allocation2 + $0x70] sm:$0xf] %vm449_vm0, %v2605_v25  ;;  %v1653_v38 = vld [vmem:[#allocation2 + $0x2c] sm:$0x1]  ;;  %v1795_v41 = vrot.slane %v1793_v22, 4 }
  0x60   : > { %v1688_v58 = vrot.slane %v1686_v46, 4  ;;  %v1798_v42 = vrot.slane %v1796_v23, 5  ;;  %v1790_v46 = vrot.slane %v1788_v33, 5  ;;  %v1716_v50 = vshll.u32 %v1653_v38, 16  ;;  %v1665_v55 = vld [vmem:[#allocation2 + $0x5c] sm:$0x1] }
  0x61   : > { %v1771_v2 = vrot.slane %v1769_v53, 4  ;;  %v1680_v16 = vrot.slane %v1679_v61, 4  ;;  %v553_v4 = vld [vmem:[#allocation2 + $0x1c] sm:$0xf]  ;;  %v564_v13 = vld [vmem:[#allocation2 + $0x48] sm:$0xf] }
  0x62   : > { %1322 = vrot.lane.b32.xlu1 %v1171_v56, %s2767_s8  ;;  %v1560_v56 = vld [vmem:[#allocation2 + $0x4c] sm:$0xf]  ;;  %v1718_v61 = vrot.slane %v1716_v50, 5  ;;  %v635_v17 = vshrl.u32 %v553_v4, 16  ;;  %v1941_v22 = vld [vmem:[#allocation2 + $0x48] sm:$0xe] }
  0x63   : > { %1336 = vrot.lane.b32.xlu0 %v1257_v62, %s2767_s8  ;;  %v1778_v62 = vshll.u32 %v1661_v52, 16  ;;  %v1775_v27 = vor.u32 %v1774_v5, %v1771_v2  ;;  %v1930_v2 = vld [vmem:[#allocation2 + $0x1c] sm:$0xf]  ;;  %v718_v25 = vshrl.u32 %v564_v13, 16 }
  0x64   : > { %v1979_v12 = vrot.slane %v1930_v2, 5 }
  0x65   : > { %v1776_v44 = vrot.slane %v1775_v27, 4 }
  0x66   : > { %1338 = vrot.lane.b32.xlu1 %v1267_v1, %s2767_s8  ;;  %v1553_v1 = vld [vmem:[#allocation2 + $0x24] sm:$0xf]  ;;  %v1981_v27 = vrot.slane %v1979_v12, 4 }
  0x67   : > { %1485 = vrot.lane.b32.xlu0 %v1432_v7, %s2768_s11  ;;  %v1700_v7 = vshll.u32 %v1651_v59, 16  ;;  %v477_v59 = vld [vmem:[%s3026_s25 + $0x10] sm:$0x3] }
  0x68   : > { %v2603_v5 = vpack.c.bf16 %v477_v59, %v477_v59 }
  0x69   : > { %v1702_v29 = vrot.slane %v1700_v7, 5  ;;  %v1929_v7 = vld [vmem:[#allocation2 + $0x18] sm:$0xe] }
  0x6a   : > { %1487 = vrot.lane.b32.xlu1 %v1435_v11, %s2768_s11  ;;  %v1689_v11 = vor.u32 %v1688_v58, %v3029_v57  ;;  %510 = vst.msk [vmem:[#allocation2 + $0x68] sm:$0x1] %vm452_vm1, %v2603_v5  ;;  %v2538_v20 = vrot.slane %v1929_v7, 9  ;;  %v1932_v5 = vld [vmem:[#allocation2 + $0x24] sm:$0xe] }
  0x6b   : > { %1501 = vrot.lane.b32.xlu0 %v1460_v18, %s2768_s11  ;;  %v1780_v18 = vrot.slane %v1778_v62, 5  ;;  %v552_v62 = vld [vmem:[#allocation2 + $0x18] sm:$0xf]  ;;  %v567_v7 = vld [vmem:[#allocation2 + $0x54] sm:$0xf] }
  0x6c   : > { %v622_v8 = vshrl.u32 %v552_v62, 16  ;;  %v625_v9 = vshll.u32 %v552_v62, 16  ;;  %v1980_v38 = vsel %vm2885_vm4, %v2538_v20, %v1979_v12  ;;  %v1933_v62 = vld [vmem:[#allocation2 + $0x28] sm:$0xf] }
  0x6e   : > { %1503 = vrot.lane.b32.xlu1 %v1463_v21, %s2768_s11  ;;  %v1664_v21 = vld [vmem:[#allocation2 + $0x58] sm:$0xf]  ;;  %v624_v23 = vrot.slane %v622_v8, 4  ;;  %v627_v24 = vrot.slane %v625_v9, 5 }
  0x6f   : > { %1489 = vrot.lane.b32.xlu0 %v1439_v28, %s2768_s11  ;;  %v1699_v28 = vrot.slane %v1697_v6, 4  ;;  %v1802_v39 = vshll.u32 %v1664_v21, 16  ;;  %v1806_v40 = vshrl.u32 %v1664_v21, 16  ;;  %v1942_v21 = vld [vmem:[#allocation2 + $0x4c] sm:$0xf] }
  0x70   : > { %v2007_v33 = vrot.slane %v1942_v21, 5  ;;  %v568_v21 = vld [vmem:[#allocation2 + $0x58] sm:$0xf] }
  0x71   : > { %v1703_v45 = vor.u32 %v1702_v29, %v1699_v28  ;;  %v1804_v53 = vrot.slane %v1802_v39, 5  ;;  %v628_v39 = vor.u32 %v627_v24, %v624_v23  ;;  %v3111_v24 = vld [vmem:[#allocation2 + $0x5c] sm:$0x1] }
  0x72   : > { %1491 = vrot.lane.b32.xlu1 %v1442_v30, %s2768_s11  ;;  %v2604_v30 = vpack.c.bf16 %v478_v15, %v478_v15 }
  0x73   : > { %1505 = vrot.lane.b32.xlu0 %v1467_v36, %s2768_s11  ;;  %v1690_v36 = vrot.slane %v1689_v11, 4  ;;  %v1704_v58 = vrot.slane %v1703_v45, 4  ;;  %v1931_v11 = vld [vmem:[#allocation2 + $0x20] sm:$0x1] }
  0x74   : > { %511 = vst.msk [vmem:[#allocation2 + $0x6c] sm:$0xf] %vm449_vm0, %v2604_v30  ;;  %v1982_v28 = vrot.slane %v1931_v11, 5  ;;  %v1986_v11 = vrot.slane %v1933_v62, 5  ;;  %v2714_v62 = vld [vmem:[%s3560_s2 + $0x10] sm:$0xff]  }
  0x75   : > { %v1695_v51 = vsel %vm2917_vm7, %v1690_v36, %v1694_v32  ;;  %v1709_v6 = vsel %vm2917_vm7, %v1704_v58, %v1708_v34  ;;  %v1943_v32 = vld [vmem:[#allocation2 + $0x50] sm:$0x1]  ;;  %v2542_v36 = vrot.slane %v1941_v22, 9  ;;  %v742_v22 = vshrl.u32 %v567_v7, 16 }
  0x76   : > { %1507 = vrot.lane.b32.xlu1 %v1470_v37, %s2768_s11  ;;  %v1785_v37 = vor.u32 %v1784_v19, %v1780_v18  ;;  %v1983_v45 = vsel %vm2885_vm4, %v1981_v27, %v1982_v28  ;;  %v2711_v27 = vld [vmem:[%s3560_s2 + $0x20] ss:$0 sps:$4 sm:$0xff]   ;;  %v519_v28 = vld [vmem:[#allocation2 + $0x1c] sm:$0xf] }
  0x77   : > { %1583 = vrot.lane.b32.xlu0 %v1551_v43, %s2769_s15  ;;  %v1685_v43 = vsel %vm2917_vm7, %v1680_v16, %v3029_v57  ;;  %v1781_v57 = vsel %vm2917_vm7, %v1776_v44, %v1780_v18  ;;  %v631_v16 = vshll.u32 %v553_v4, 16  ;;  %v565_v18 = vld [vmem:[#allocation2 + $0x4c] sm:$0xf]  ;;  %535 = vst.msk [vmem:[#allocation3 + $0x14] sm:$0xf] %vm449_vm0, %v519_v28  ;;  %2658 = vmatprep.subr.msk.bf16.mxu0 %vm2222_vm8, %v2711_v27 }
  0x78   : > { %v1786_v52 = vrot.slane %v1785_v37, 4  ;;  %v727_v29 = vshll.u32 %v565_v18, 16  ;;  %v731_v30 = vshrl.u32 %v565_v18, 16  ;;  %v554_v37 = vld [vmem:[#allocation2 + $0x20] sm:$0x1]  ;;  %2659 = vmatprep.subr.msk.bf16.mxu1 %vm2222_vm8, %v2711_v27 }
  0x79   : > { %v641_v50 = vshll.u32 %v554_v37, 16  ;;  %v751_v37 = vshll.u32 %v568_v21, 16  ;;  %v529_v28 = vld [vmem:[#allocation2 + $0x58] sm:$0xf] }
  0x7a   : > { %1585 = vrot.lane.b32.xlu1 %v1552_v49, %s2769_s15  ;;  %v1713_v49 = vor.u32 %v1712_v35, %v1708_v34  ;;  %v1791_v63 = vsel %vm2917_vm7, %v1786_v52, %v1790_v46  ;;  %v633_v34 = vrot.slane %v631_v16, 5  ;;  %v637_v35 = vrot.slane %v635_v17, 4  ;;  %545 = vst.msk [vmem:[#allocation3 + $0x3c] sm:$0xf] %vm449_vm0, %v529_v28 }
  0x7b   : > { %1599 = vrot.lane.b32.xlu0 %v1559_v54, %s2769_s15  ;;  %v1808_v54 = vrot.slane %v1806_v40, 4  ;;  %v720_v40 = vrot.slane %v718_v25, 4  ;;  %v733_v44 = vrot.slane %v731_v30, 4  ;;  %v2009_v46 = vrot.slane %v2007_v33, 4 }
  0x7c   : > { %v1714_v60 = vrot.slane %v1713_v49, 4  ;;  %v638_v49 = vor.u32 %v637_v35, %v633_v34  ;;  %v2008_v52 = vsel %vm2885_vm4, %v2542_v36, %v2007_v33  ;;  %v518_v33 = vld [vmem:[#allocation2 + $0x18] sm:$0xf] }
  0x7d   : > { %v1809_v0 = vor.u32 %v1808_v54, %v1804_v53  ;;  %534 = vst.msk [vmem:[#allocation3 + $0x10] sm:$0xf] %vm449_vm0, %v518_v33 }
  0x7e   : > { %1601 = vrot.lane.b32.xlu1 %v1560_v56, %s2769_s15  ;;  %v1799_v56 = vor.u32 %v1798_v42, %v1795_v41  ;;  %v2010_v42 = vrot.slane %v1943_v32, 5 }
  0x7f   : > { %1587 = vrot.lane.b32.xlu0 %v1553_v1, %s2769_s15  ;;  %v1812_v1 = vshll.u32 %v1665_v55, 16  ;;  %v1810_v14 = vrot.slane %v1809_v0, 4  ;;  %v555_v55 = vld [vmem:[#allocation2 + $0x24] sm:$0xf]  ;;  %v3091_v0 = vld [vmem:[#allocation2 + $0x2c] sm:$0x1] }
  0x80   : > { %v1800_v3 = vrot.slane %v1799_v56, 4  ;;  %v2011_v59 = vsel %vm2885_vm4, %v2009_v46, %v2010_v42  ;;  %v646_v2 = vshrl.u32 %v555_v55, 16  ;;  %v1989_v18 = vrot.slane %v3091_v0, 5 }
  0x81   : > { %v1814_v15 = vrot.slane %v1812_v1, 5  ;;  %v556_v1 = vld [vmem:[#allocation2 + $0x28] sm:$0xf] }
  0x82   : > { %1589 = vrot.lane.b32.xlu1 %v1554_v10, %s2769_s15  ;;  %v1719_v10 = vsel %vm2917_vm7, %v1714_v60, %v1718_v61  ;;  %v1805_v19 = vsel %vm2917_vm7, %v1800_v3, %v1804_v53  ;;  %v629_v53 = vrot.slane %v628_v39, 4  ;;  %v639_v60 = vrot.slane %v638_v49, 4  ;;  %v2712_v39 = vld [vmem:[%s3560_s2 + $0x18] sm:$0xff]  }
  0x83   : > { %1603 = vrot.lane.b32.xlu0 %v1561_v26, %s2769_s15  ;;  %v721_v26 = vshll.u32 %v564_v13, 16  ;;  %v643_v61 = vrot.slane %v641_v50, 5  ;;  %v3100_v13 = vld [vmem:[#allocation2 + $0x58] sm:$0xf]  ;;  %v659_v16 = vshrl.u32 %v556_v1, 16  ;;  %v648_v20 = vrot.slane %v646_v2, 4 }
  0x84   : > { %v634_v3 = vsel %vm2917_vm7, %v629_v53, %v633_v34  ;;  %v2014_v32 = vrot.slane %v3100_v13, 5  ;;  %v480_v34 = vld [vmem:[%s3026_s25 + $0x28] sm:$0x3]  ;;  %v2224_v49 = vsel %vm2222_vm8, %v2711_v27, 0  ;;  %v849_v27 = vld [vmem:[#allocation2 + $0x4c] sm:$0xf] }
  0x85   : > { %v723_v41 = vrot.slane %v721_v26, 5  ;;  %v644_v12 = vsel %vm2917_vm7, %v639_v60, %v643_v61  ;;  %v745_v26 = vshll.u32 %v567_v7, 16  ;;  %v661_v36 = vrot.slane %v659_v16, 4  ;;  %2623 = vmatpush3.bf16.msra.mxu0 %v2224_v49  ;;  %2653 = vmatpush3.bf16.msra.mxu1 %v2224_v49 }
  0x86   : > { %1605 = vrot.lane.b32.xlu1 %v1562_v31, %s2769_s15  ;;  %v1815_v31 = vsel %vm2917_vm7, %v1810_v14, %v1814_v15  ;;  %v3102_v14 = vld [vmem:[#allocation2 + $0x54] sm:$0xe]  ;;  %v655_v15 = vshll.u32 %v556_v1, 16  ;;  %v2606_v50 = vpack.c.bf16 %v480_v34, %v480_v34  ;;  %v3145_v60 = vrot.slane %v751_v37, 5  ;;  %2624 = vmatprep.subr.bf16.mxu0 %v2712_v39  ;;  %v569_v1 = vld [vmem:[#allocation2 + $0x5c] sm:$0x1] }
  0x87   : > { %1864 = vrot.lane.b32.xlu0 %v1685_v43, %s2770_s26  ;;  %v3075_v43 = vrot.slane %v727_v29, 5  ;;  %v724_v54 = vor.u32 %v723_v41, %v720_v40  ;;  %v2543_v42 = vrot.slane %v3102_v14, 9  ;;  %v747_v46 = vrot.slane %v745_v26, 5  ;;  %2649 = vmatprep.subr.bf16.mxu1 %v2712_v39  ;;  %v837_v14 = vld [vmem:[#allocation2 + $0x1c] sm:$0xf] }
  0x88   : > { %v3124_v35 = vrot.slane %v655_v15, 5  ;;  %513 = vst.msk [vmem:[#allocation2 + $0x74] sm:$0x1] %vm452_vm1, %v2606_v50  ;;  %v838_v26 = vld [vmem:[#allocation2 + $0x20] sm:$0x1]  ;;  %v925_v37 = vrot.slane %v849_v27, 5 }
  0x89   : > { %v725_v4 = vrot.slane %v724_v54, 4  ;;  %v2015_v2 = vsel %vm2885_vm4, %v2543_v42, %v2014_v32  ;;  %2625 = vmatpush3.bf16.msra.mxu0 %v2712_v39  ;;  %2654 = vmatpush3.bf16.msra.mxu1 %v2712_v39  ;;  %v840_v39 = vld [vmem:[#allocation2 + $0x28] sm:$0xf]  ;;  %v1015_v27 = vld [vmem:[#allocation2 + $0x54] sm:$0xf]  ;;  %vm2197_vm1 = vcmask 588800  }
  0x8a   : > { %1866 = vrot.lane.b32.xlu1 %v1695_v51, %s2770_s26  ;;  %v566_v51 = vld [vmem:[#allocation2 + $0x50] sm:$0x1]  ;;  %2626 = vmatprep.subr.bf16.mxu0 %v2714_v62  ;;  %v904_v49 = vrot.slane %v840_v39, 5  ;;  %v1110_v39 = vld [vmem:[#allocation2 + $0x34] sm:$0xf] }
  0x8b   : > { %1880 = vrot.lane.b32.xlu0 %v1781_v57, %s2770_s26  ;;  %v734_v57 = vor.u32 %v733_v44, %v3075_v43  ;;  %v737_v58 = vshll.u32 %v566_v51, 16  ;;  %v730_v23 = vsel %vm2917_vm7, %v725_v4, %v3075_v43  ;;  %v557_v43 = vld [vmem:[#allocation2 + $0x2c] sm:$0x1]  ;;  %v744_v44 = vrot.slane %v742_v22, 4  ;;  %2650 = vmatprep.subr.bf16.mxu1 %v2714_v62 }
  0x8c   : > { %v527_v51 = vld [vmem:[#allocation2 + $0x4c] sm:$0xf] }
  0x8d   : > { %v735_v9 = vrot.slane %v734_v57, 4  ;;  %v2017_v57 = vrot.slane %v3111_v24, 5  ;;  %543 = vst.msk [vmem:[#allocation3 + $0x34] sm:$0xf] %vm449_vm0, %v527_v51  ;;  %v748_v4 = vor.u32 %v747_v46, %v744_v44  ;;  %2627 = vmatpush3.bf16.msra.mxu0 %v2714_v62  ;;  %v897_v24 = vrot.slane %v837_v14, 5  ;;  %2655 = vmatpush3.bf16.msra.mxu1 %v2714_v62 }
  0x8e   : > { %1882 = vrot.lane.b32.xlu1 %v1791_v63, %s2770_s26  ;;  %v839_v44 = vld [vmem:[#allocation2 + $0x24] sm:$0xe]  ;;  %v841_v51 = vld [vmem:[#allocation2 + $0x2c] sm:$0x1]  ;;  %v853_v62 = vld [vmem:[#allocation2 + $0x5c] sm:$0x1] }
  0x8f   : > { %1868 = vrot.lane.b32.xlu0 %v1709_v6, %s2770_s26  ;;  %v649_v6 = vshll.u32 %v555_v55, 16  ;;  %v2016_v55 = vrot.slane %v2014_v32, 4  ;;  %v749_v16 = vrot.slane %v748_v4, 4  ;;  %v528_v32 = vld [vmem:[#allocation2 + $0x54] sm:$0xf] }
  0x90   : > { %544 = vst.msk [vmem:[#allocation3 + $0x38] sm:$0xf] %vm449_vm0, %v528_v32 }
  0x91   : > { %v651_v25 = vrot.slane %v649_v6, 5  ;;  %v2018_v6 = vsel %vm2885_vm4, %v2016_v55, %v2017_v57  ;;  %v851_v57 = vld [vmem:[#allocation2 + $0x54] sm:$0xe] }
  0x92   : > { %1870 = vrot.lane.b32.xlu1 %v1719_v10, %s2770_s26  ;;  %v739_v10 = vrot.slane %v737_v58, 5  ;;  %v662_v58 = vor.u32 %v661_v36, %v3124_v35  ;;  %v900_v36 = vrot.slane %v838_v26, 5 }
  0x93   : > { %1884 = vrot.lane.b32.xlu0 %v1805_v19, %s2770_s26  ;;  %v2539_v19 = vrot.slane %v1932_v5, 9 }
  0x94   : > { %v740_v30 = vsel %vm2917_vm7, %v735_v9, %v739_v10  ;;  %v663_v7 = vrot.slane %v662_v58, 4  ;;  %v906_v58 = vrot.slane %v904_v49, 4 }
  0x95   : > { %v1987_v41 = vsel %vm2885_vm4, %v2539_v19, %v1986_v11 }
  0x96   : > { %1886 = vrot.lane.b32.xlu1 %v1815_v31, %s2770_s26  ;;  %v1988_v31 = vrot.slane %v1986_v11, 4  ;;  %v761_v11 = vshll.u32 %v569_v1, 16 }
  0x97   : > { %2033 = vrot.lane.b32.xlu0 %v1980_v38, %s2771_s27  ;;  %v755_v38 = vshrl.u32 %v568_v21, 16 }
  0x98   : > { %v1990_v54 = vsel %vm2885_vm4, %v1988_v31, %v1989_v18  ;;  %v521_v18 = vld [vmem:[#allocation2 + $0x28] sm:$0xf] }
  0x99   : > { %v3083_v56 = vpop.permute.xlu0 %937  ;;  %v757_v61 = vrot.slane %v755_v38, 4  ;;  %537 = vst.msk [vmem:[#allocation3 + $0x1c] sm:$0xf] %vm449_vm0, %v521_v18  ;;  %v1118_v18 = vld [vmem:[#allocation2 + $0x54] sm:$0xf] }
  0x9a   : > { %2035 = vrot.lane.b32.xlu1 %v1983_v45, %s2771_s27  ;;  %v652_v45 = vor.u32 %v651_v25, %v648_v20  ;;  %v836_v20 = vld [vmem:[#allocation2 + $0x18] sm:$0xe]  ;;  %v2717_v25 = vld [vmem:[%s3560_s2] sm:$0xff]   ;;  %v1272_v26 = vshll.u32 %v1118_v18, 16 }
  0x9b   : > { %2049 = vrot.lane.b32.xlu0 %v2008_v52, %s2771_s27  ;;  %v526_v52 = vld [vmem:[#allocation2 + $0x48] sm:$0xf]  ;;  %v758_v10 = vor.u32 %v757_v61, %v3145_v60  ;;  %v2524_v31 = vrot.slane %v836_v20, 9 }
  0x9c   : > { %v3088_v63 = vpop.permute.xlu1 %939  ;;  %542 = vst.msk [vmem:[#allocation3 + $0x30] sm:$0xf] %vm449_vm0, %v526_v52 }
  0x9d   : > { %v3096_v8 = vpop.permute.xlu0 %953  ;;  %v759_v22 = vrot.slane %v758_v10, 4 }
  0x9e   : > { %2051 = vrot.lane.b32.xlu1 %v2011_v59, %s2771_s27  ;;  %v665_v59 = vshll.u32 %v557_v43, 16 }
  0x9f   : > { %773 = vrot.lane.b32.xlu0 %v634_v3, %s2765_s6  ;;  %v653_v3 = vrot.slane %v652_v45, 4  ;;  %v927_v45 = vrot.slane %v925_v37, 4 }
  0xa0   : > { %v3104_v17 = vpop.permute.xlu1 %955  ;;  %v667_v9 = vrot.slane %v665_v59, 5  ;;  %v907_v59 = vrot.slane %v841_v51, 5  ;;  %v1010_v51 = vld [vmem:[#allocation2 + $0x34] sm:$0xf] }
  0xa1   : > { %v3117_v29 = vpop.permute.xlu0 %941  ;;  %v658_v15 = vsel %vm2917_vm7, %v653_v3, %v3124_v35  ;;  %v899_v35 = vrot.slane %v897_v24, 4 }
  0xa2   : > { %775 = vrot.lane.b32.xlu1 %v644_v12, %s2765_s6  ;;  %v2716_v12 = vld [vmem:[%s3560_s2 + $0x8] sm:$0xff]   ;;  %v668_v21 = vsel %vm2917_vm7, %v663_v7, %v667_v9  ;;  %v908_v3 = vsel %vm2885_vm4, %v906_v58, %v907_v59  ;;  %v1106_v9 = vld [vmem:[#allocation2 + $0x24] sm:$0xf]  ;;  %v1017_v59 = vld [vmem:[#allocation2 + $0x60] sm:$0xf] }
  0xa3   : > { %789 = vrot.lane.b32.xlu0 %v730_v23, %s2765_s6  ;;  %v763_v23 = vrot.slane %v761_v11, 5  ;;  %2628 = vmatprep.subr.bf16.mxu0 %v2716_v12  ;;  %v1173_v14 = vshrl.u32 %v1106_v9, 16  ;;  %v1122_v58 = vld [vmem:[#allocation2 + $0x64] sm:$0xf] }
  0xa4   : > { %v3130_v40 = vpop.permute.xlu1 %943  ;;  %2651 = vmatprep.subr.bf16.mxu1 %v2716_v12  ;;  %2629 = vmatpush3.bf16.msra.mxu0 %v2716_v12 }
  0xa5   : > { %v3137_v53 = vpop.permute.xlu0 %957  ;;  %v764_v34 = vsel %vm2917_vm7, %v759_v22, %v763_v23  ;;  %2630 = vmatprep.subr.bf16.mxu0 %v2717_v25  ;;  %2656 = vmatpush3.bf16.msra.mxu1 %v2716_v12  ;;  %v1107_v12 = vld [vmem:[#allocation2 + $0x28] sm:$0xf]  ;;  %v1119_v22 = vld [vmem:[#allocation2 + $0x58] sm:$0xf] }
  0xa6   : > { %791 = vrot.lane.b32.xlu1 %v740_v30, %s2765_s6  ;;  %v754_v30 = vsel %vm2917_vm7, %v749_v16, %v3145_v60  ;;  %2652 = vmatprep.subr.bf16.mxu1 %v2717_v25  ;;  %v1007_v16 = vld [vmem:[#allocation2 + $0x24] sm:$0xf]  ;;  %v1182_v20 = vshll.u32 %v1107_v12, 16  ;;  %v1278_v32 = vshll.u32 %v1119_v22, 16 }
  0xa7   : > { %2037 = vrot.lane.b32.xlu0 %v1987_v41, %s2771_s27  ;;  %v898_v41 = vsel %vm2885_vm4, %v2524_v31, %v897_v24  ;;  %v1175_v24 = vrot.slane %v1173_v14, 4 }
  0xa8   : > { %v3151_v0 = vpop.permute.xlu1 %959  ;;  %2631 = vmatpush3.bf16.msra.mxu0 %v2717_v25 }
  0xa9   : > { %v766_v5 = vpop.permute.xlu0 %765  ;;  %2657 = vmatpush3.bf16.msra.mxu1 %v2717_v25 }
  0xaa   : > { %2039 = vrot.lane.b32.xlu1 %v1990_v54, %s2771_s27  ;;  %814 = vst.msk [vmem:[#allocation3] sm:$0xf] %vm813_vm9, %v766_v5  ;;  %v2525_v54 = vrot.slane %v839_v44, 9  ;;  %v935_v5 = vrot.slane %v853_v62, 5 }
  0xab   : > { %2053 = vrot.lane.b32.xlu0 %v2015_v2, %s2771_s27  ;;  %986 = vst.msk [vmem:[#allocation3] sm:$0xf] %vm985_vm10, %v3083_v56  ;;  %v520_v56 = vld [vmem:[#allocation2 + $0x24] sm:$0xf] }
  0xac   : > { %v782_v13 = vpop.permute.xlu1 %781  ;;  %536 = vst.msk [vmem:[#allocation3 + $0x18] sm:$0xf] %vm449_vm0, %v520_v56  ;;  %v905_v1 = vsel %vm2885_vm4, %v2525_v54, %v904_v49  ;;  %v1186_v56 = vshrl.u32 %v1107_v12, 16  ;;  %v1210_v54 = vshrl.u32 %v1110_v39, 16  ;;  %v1306_v12 = vshrl.u32 %v1122_v58, 16 }
  0xad   : > { %822 = vst.msk [vmem:[#allocation3 + $0x20] sm:$0xf] %vm813_vm9, %v782_v13  ;;  %v768_v19 = vpop.permute.xlu0 %767  ;;  %vm2081_vm0 = vcmask 585216  }
  0xae   : > { %2055 = vrot.lane.b32.xlu1 %v2018_v6, %s2771_s27  ;;  %994 = vst.msk [vmem:[#allocation3 + $0x20] sm:$0xf] %vm985_vm10, %v3096_v8  ;;  %v1188_v31 = vrot.slane %v1186_v56, 4 }
  0xaf   : > { %815 = vst.msk [vmem:[#allocation3 + $0x4] sm:$0xf] %vm813_vm9, %v768_v19  ;;  %777 = vrot.lane.b32.xlu0 %v658_v15, %s2765_s6  ;;  %v1176_v15 = vshll.u32 %v1106_v9, 16 }
  0xb0   : > { %v784_v8 = vpop.permute.xlu1 %783  ;;  %987 = vst.msk [vmem:[#allocation3 + $0x4] sm:$0xf] %vm985_vm10, %v3088_v63  ;;  %v848_v63 = vld [vmem:[#allocation2 + $0x48] sm:$0xe] }
  0xb1   : > { %823 = vst.msk [vmem:[#allocation3 + $0x24] sm:$0xf] %vm813_vm9, %v784_v8  ;;  %v770_v33 = vpop.permute.xlu0 %769  ;;  %v2528_v42 = vrot.slane %v848_v63, 9  ;;  %v1178_v25 = vrot.slane %v1176_v15, 5  ;;  %v1269_v8 = vshrl.u32 %v1118_v18, 16 }
  0xb2   : > { %779 = vrot.lane.b32.xlu1 %v668_v21, %s2765_s6  ;;  %995 = vst.msk [vmem:[#allocation3 + $0x24] sm:$0xf] %vm985_vm10, %v3104_v17  ;;  %v850_v17 = vld [vmem:[#allocation2 + $0x50] sm:$0x1]  ;;  %v1008_v21 = vld [vmem:[#allocation2 + $0x28] sm:$0xf] }
  0xb3   : > { %816 = vst.msk [vmem:[#allocation3 + $0x8] sm:$0xf] %vm813_vm9, %v770_v33  ;;  %793 = vrot.lane.b32.xlu0 %v754_v30, %s2765_s6  ;;  %v928_v46 = vrot.slane %v850_v17, 5  ;;  %v926_v52 = vsel %vm2885_vm4, %v2528_v42, %v925_v37  ;;  %v3244_v30 = vrot.slane %v1182_v20, 5  ;;  %v1282_v33 = vshrl.u32 %v1119_v22, 16 }
  0xb4   : > { %v772_v38 = vpop.permute.xlu1 %771  ;;  %988 = vst.msk [vmem:[#allocation3 + $0x8] sm:$0xf] %vm985_vm10, %v3117_v29  ;;  %v901_v29 = vsel %vm2885_vm4, %v899_v35, %v900_v36  ;;  %v1109_v63 = vld [vmem:[#allocation2 + $0x30] sm:$0xf]  ;;  %v1108_v35 = vld [vmem:[#allocation2 + $0x2c] sm:$0x1]  ;;  %v1179_v37 = vor.u32 %v1178_v25, %v1175_v24 }
  0xb5   : > { %817 = vst.msk [vmem:[#allocation3 + $0xc] sm:$0xf] %vm813_vm9, %v772_v38  ;;  %v786_v43 = vpop.permute.xlu0 %785  ;;  %v1271_v38 = vrot.slane %v1269_v8, 4  ;;  %v1274_v17 = vrot.slane %v1272_v26, 5  ;;  %v1197_v42 = vshrl.u32 %v1109_v63, 16  ;;  %v1284_v49 = vrot.slane %v1282_v33, 4 }
  0xb6   : > { %795 = vrot.lane.b32.xlu1 %v764_v34, %s2765_s6  ;;  %989 = vst.msk [vmem:[#allocation3 + $0xc] sm:$0xf] %vm985_vm10, %v3130_v40  ;;  %v852_v40 = vld [vmem:[#allocation2 + $0x58] sm:$0xf]  ;;  %v1308_v8 = vrot.slane %v1306_v12, 4  ;;  %s2490_s6 = sshll.u32 %s3579_s16, 5 }
  0xb7   : > { %824 = vst.msk [vmem:[#allocation3 + $0x28] sm:$0xf] %vm813_vm9, %v786_v43  ;;  %945 = vrot.lane.b32.xlu0 %v898_v41, %s2764_s5  ;;  %v932_v60 = vrot.slane %v852_v40, 5  ;;  %v1016_v34 = vld [vmem:[#allocation2 + $0x58] sm:$0xf]  ;;  %v1200_v43 = vshll.u32 %v1109_v63, 16 }
  0xb8   : > { %v788_v50 = vpop.permute.xlu1 %787  ;;  %996 = vst.msk [vmem:[#allocation3 + $0x28] sm:$0xf] %vm985_vm10, %v3137_v53  ;;  %v929_v53 = vsel %vm2885_vm4, %v927_v45, %v928_v46  ;;  %v1009_v41 = vld [vmem:[#allocation2 + $0x30] sm:$0xf]  ;;  %v1192_v45 = vshll.u32 %v1108_v35, 16  ;;  %v3251_v46 = vrot.slane %v1278_v32, 5 }
  0xb9   : > { %825 = vst.msk [vmem:[#allocation3 + $0x2c] sm:$0xf] %vm813_vm9, %v788_v50  ;;  %v1036_v55 = vpop.permute.xlu0 %1035  ;;  %v934_v4 = vrot.slane %v932_v60, 4  ;;  %v1121_v50 = vld [vmem:[#allocation2 + $0x60] sm:$0xf] }
  0xba   : > { %947 = vrot.lane.b32.xlu1 %v901_v29, %s2764_s5  ;;  %997 = vst.msk [vmem:[#allocation3 + $0x2c] sm:$0xf] %vm985_vm10, %v3151_v0  ;;  %v2529_v0 = vrot.slane %v851_v57, 9  ;;  %v1189_v29 = vor.u32 %v1188_v31, %v3244_v30  ;;  %v1120_v40 = vld [vmem:[#allocation2 + $0x5c] sm:$0x1]  ;;  %v1180_v57 = vrot.slane %v1179_v37, 4 }
  0xbb   : > { %1084 = vst.msk [vmem:[#allocation3] sm:$0xf] %vm1083_vm11, %v1036_v55  ;;  %961 = vrot.lane.b32.xlu0 %v926_v52, %s2764_s5  ;;  %v936_v11 = vsel %vm2885_vm4, %v934_v4, %v935_v5  ;;  %v1206_v52 = vshll.u32 %v1110_v39, 16  ;;  %v1293_v62 = vshrl.u32 %v1121_v50, 16  ;;  %v1285_v4 = vor.u32 %v1284_v49, %v3251_v46  ;;  %v1389_v49 = vld [vmem:[#allocation2 + $0x2c] sm:$0x1] }
  0xbc   : > { %v1038_v61 = vpop.permute.xlu1 %1037  ;;  %v933_v7 = vsel %vm2885_vm4, %v2529_v0, %v932_v60  ;;  %v1199_v60 = vrot.slane %v1197_v42, 4  ;;  %v1288_v5 = vshll.u32 %v1120_v40, 16  ;;  %v1185_v14 = vsel %vm2917_vm7, %v1180_v57, %v3244_v30  ;;  %v1387_v42 = vld [vmem:[#allocation2 + $0x24] sm:$0xe] }
  0xbd   : > { %1085 = vst.msk [vmem:[#allocation3 + $0x4] sm:$0xf] %vm1083_vm11, %v1038_v61  ;;  %v1052_v2 = vpop.permute.xlu0 %1051  ;;  %v1202_v61 = vrot.slane %v1200_v43, 5  ;;  %v1208_v9 = vrot.slane %v1206_v52, 5  ;;  %v1295_v18 = vrot.slane %v1293_v62, 4  ;;  %v1286_v56 = vrot.slane %v1285_v4, 4 }
  0xbe   : > { %963 = vrot.lane.b32.xlu1 %v929_v53, %s2764_s5  ;;  %1092 = vst.msk [vmem:[#allocation3 + $0x20] sm:$0xf] %vm1083_vm11, %v1052_v2  ;;  %v1275_v53 = vor.u32 %v1274_v17, %v1271_v38  ;;  %v1190_v2 = vrot.slane %v1189_v29, 4  ;;  %v1388_v38 = vld [vmem:[#allocation2 + $0x28] sm:$0xf]  ;;  %v2532_v40 = vrot.slane %v1387_v42, 9 }
  0xbf   : > { %949 = vrot.lane.b32.xlu0 %v905_v1, %s2764_s5  ;;  %v1296_v1 = vshll.u32 %v1121_v50, 16  ;;  %v1400_v50 = vld [vmem:[#allocation2 + $0x58] sm:$0xf] }
  0xc0   : > { %v1054_v6 = vpop.permute.xlu1 %1053  ;;  %v1276_v15 = vrot.slane %v1275_v53, 4  ;;  %v1448_v53 = vrot.slane %v1389_v49, 5 }
  0xc1   : > { %1093 = vst.msk [vmem:[#allocation3 + $0x24] sm:$0xf] %vm1083_vm11, %v1054_v6  ;;  %v1040_v10 = vpop.permute.xlu0 %1039  ;;  %v1111_v6 = vld [vmem:[#allocation2 + $0x38] sm:$0x1] }
  0xc2   : > { %951 = vrot.lane.b32.xlu1 %v908_v3, %s2764_s5  ;;  %1086 = vst.msk [vmem:[#allocation3 + $0x8] sm:$0xf] %vm1083_vm11, %v1040_v10  ;;  %v1194_v3 = vrot.slane %v1192_v45, 5  ;;  %v1212_v10 = vrot.slane %v1210_v54, 4  ;;  %v1216_v22 = vshll.u32 %v1111_v6, 16  ;;  %v1445_v45 = vrot.slane %v1388_v38, 5 }
  0xc3   : > { %965 = vrot.lane.b32.xlu0 %v933_v7, %s2764_s5  ;;  %v1018_v7 = vld [vmem:[#allocation2 + $0x64] sm:$0xf]  ;;  %v1399_v54 = vld [vmem:[#allocation2 + $0x54] sm:$0xe] }
  0xc4   : > { %v1042_v13 = vpop.permute.xlu1 %1041  ;;  %v1213_v24 = vor.u32 %v1212_v10, %v1208_v9  ;;  %v1447_v57 = vrot.slane %v1445_v45, 4  ;;  %v1446_v62 = vsel %vm2885_vm4, %v2532_v40, %v1445_v45  ;;  %v1403_v10 = vld [vmem:[#allocation2 + $0x64] sm:$0xf] }
  0xc5   : > { %1087 = vst.msk [vmem:[#allocation3 + $0xc] sm:$0xf] %vm1083_vm11, %v1042_v13  ;;  %v1056_v19 = vpop.permute.xlu0 %1055 }
  0xc6   : > { %967 = vrot.lane.b32.xlu1 %v936_v11, %s2764_s5  ;;  %1094 = vst.msk [vmem:[#allocation3 + $0x28] sm:$0xf] %vm1083_vm11, %v1056_v19  ;;  %v1302_v11 = vshll.u32 %v1122_v58, 16  ;;  %v1298_v19 = vrot.slane %v1296_v1, 5  ;;  %v1214_v63 = vrot.slane %v1213_v24, 4  ;;  %v1473_v58 = vrot.slane %v1400_v50, 5 }
  0xc7   : > { %1043 = vrot.lane.b32.xlu0 %v1007_v16, %s2766_s7  ;;  %v1203_v16 = vor.u32 %v1202_v61, %v1199_v60  ;;  %v1401_v60 = vld [vmem:[#allocation2 + $0x5c] sm:$0x1]  ;;  %v1391_v61 = vld [vmem:[#allocation2 + $0x34] sm:$0xf]  ;;  %v2536_v1 = vrot.slane %v1399_v54, 9  ;;  %s2489_s5 = sshll.u32 %s3583_s22, 1 }
  0xc8   : > { %v1058_v23 = vpop.permute.xlu1 %1057  ;;  %v1304_v25 = vrot.slane %v1302_v11, 5  ;;  %v1299_v31 = vor.u32 %v1298_v19, %v1295_v18  ;;  %v1475_v4 = vrot.slane %v1473_v58, 4  ;;  %v1452_v6 = vrot.slane %v1391_v61, 5  ;;  %v1657_v54 = vld [vmem:[#allocation2 + $0x3c] sm:$0xf] }
  0xc9   : > { %1095 = vst.msk [vmem:[#allocation3 + $0x2c] sm:$0xf] %vm1083_vm11, %v1058_v23  ;;  %v1317_v28 = vpop.permute.xlu0 %1316  ;;  %v1195_v23 = vsel %vm2917_vm7, %v1190_v2, %v1194_v3  ;;  %v1204_v30 = vrot.slane %v1203_v16, 4  ;;  %v1390_v2 = vld [vmem:[#allocation2 + $0x30] sm:$0xe]  ;;  %v1449_v3 = vsel %vm2885_vm4, %v1447_v57, %v1448_v53  ;;  %v1474_v11 = vsel %vm2885_vm4, %v2536_v1, %v1473_v58 }
  0xca   : > { %1045 = vrot.lane.b32.xlu1 %v1008_v21, %s2766_s7  ;;  %1365 = vst.msk [vmem:[#allocation3] sm:$0xf] %vm1364_vm12, %v1317_v28  ;;  %v1290_v21 = vrot.slane %v1288_v5, 5  ;;  %v1281_v28 = vsel %vm2917_vm7, %v1276_v15, %v3251_v46  ;;  %v1309_v35 = vor.u32 %v1308_v8, %v1304_v25  ;;  %v1300_v39 = vrot.slane %v1299_v31, 4  ;;  %v1656_v57 = vld [vmem:[#allocation2 + $0x38] sm:$0x1] }
  0xcb   : > { %1059 = vrot.lane.b32.xlu0 %v1015_v27, %s2766_s7  ;;  %v1123_v27 = vld [vmem:[#allocation2 + $0x68] sm:$0x1]  ;;  %v1209_v17 = vsel %vm2917_vm7, %v1204_v30, %v1208_v9  ;;  %v1476_v5 = vrot.slane %v1401_v60, 5  ;;  %v1392_v9 = vld [vmem:[#allocation2 + $0x38] sm:$0x1]  ;;  %v2533_v12 = vrot.slane %v1390_v2, 9 }
  0xcc   : > { %v1319_v36 = vpop.permute.xlu1 %1318  ;;  %v1291_v33 = vsel %vm2917_vm7, %v1286_v56, %v1290_v21  ;;  %v1454_v16 = vrot.slane %v1452_v6, 4  ;;  %v1455_v18 = vrot.slane %v1392_v9, 5  ;;  %v1480_v19 = vrot.slane %v1403_v10, 5  ;;  %v1404_v56 = vld [vmem:[#allocation2 + $0x68] sm:$0x1] }
  0xcd   : > { %1366 = vst.msk [vmem:[#allocation3 + $0x4] sm:$0xf] %vm1364_vm12, %v1319_v36  ;;  %v1333_v44 = vpop.permute.xlu0 %1332  ;;  %v1312_v36 = vshll.u32 %v1123_v27, 16  ;;  %v1477_v15 = vsel %vm2885_vm4, %v1475_v4, %v1476_v5  ;;  %v1453_v21 = vsel %vm2885_vm4, %v2533_v12, %v1452_v6  ;;  %v1483_v8 = vrot.slane %v1404_v56, 5  ;;  %v1658_v61 = vld [vmem:[#allocation2 + $0x40] sm:$0xf] }
  0xce   : > { %1061 = vrot.lane.b32.xlu1 %v1016_v34, %s2766_s7  ;;  %1373 = vst.msk [vmem:[#allocation3 + $0x20] sm:$0xf] %vm1364_vm12, %v1333_v44  ;;  %v1218_v34 = vrot.slane %v1216_v22, 5  ;;  %v1310_v44 = vrot.slane %v1309_v35, 4  ;;  %v1456_v24 = vsel %vm2885_vm4, %v1454_v16, %v1455_v18  ;;  %v1555_v35 = vld [vmem:[#allocation2 + $0x30] sm:$0xf] }
  0xcf   : > { %1047 = vrot.lane.b32.xlu0 %v1009_v41, %s2766_s7  ;;  %v1314_v29 = vrot.slane %v1312_v36, 5  ;;  %v1666_v36 = vld [vmem:[#allocation2 + $0x60] sm:$0xf]  ;;  %v1745_v1 = vshrl.u32 %v1657_v54, 16  ;;  %v1740_v4 = vshll.u32 %v1656_v57, 16  ;;  %v1758_v12 = vshrl.u32 %v1658_v61, 16 }
  0xd0   : > { %v1335_v55 = vpop.permute.xlu1 %1334  ;;  %v1219_v43 = vsel %vm2917_vm7, %v1214_v63, %v1218_v34  ;;  %v1820_v45 = vshll.u32 %v1666_v36, 16  ;;  %v1558_v9 = vld [vmem:[#allocation2 + $0x40] sm:$0xf]  ;;  %v1668_v10 = vld [vmem:[#allocation2 + $0x68] sm:$0x1] }
  0xd1   : > { %1374 = vst.msk [vmem:[#allocation3 + $0x24] sm:$0xf] %vm1364_vm12, %v1335_v55  ;;  %v1321_v0 = vpop.permute.xlu0 %1320  ;;  %v1315_v55 = vsel %vm2917_vm7, %v1310_v44, %v1314_v29  ;;  %v1817_v29 = vshrl.u32 %v1666_v36, 16  ;;  %v1670_v16 = vld [vmem:[#allocation2 + $0x70] sm:$0xf] }
  0xd2   : > { %1049 = vrot.lane.b32.xlu1 %v1010_v51, %s2766_s7  ;;  %1367 = vst.msk [vmem:[#allocation3 + $0x8] sm:$0xf] %vm1364_vm12, %v1321_v0  ;;  %v1305_v51 = vsel %vm2917_vm7, %v1300_v39, %v1304_v25  ;;  %v1482_v25 = vrot.slane %v1480_v19, 4  ;;  %v1556_v39 = vld [vmem:[#allocation2 + $0x34] sm:$0xf]  ;;  %v1822_v60 = vrot.slane %v1820_v45, 5 }
  0xd3   : > { %1063 = vrot.lane.b32.xlu0 %v1017_v59, %s2766_s7  ;;  %v1565_v18 = vld [vmem:[#allocation2 + $0x6c] sm:$0xf] }
  0xd4   : > { %v1323_v13 = vpop.permute.xlu1 %1322  ;;  %v1484_v31 = vsel %vm2885_vm4, %v1482_v25, %v1483_v8  ;;  %v1742_v25 = vrot.slane %v1740_v4, 5 }
  0xd5   : > { %1368 = vst.msk [vmem:[#allocation3 + $0xc] sm:$0xf] %vm1364_vm12, %v1323_v13  ;;  %v1337_v20 = vpop.permute.xlu0 %1336 }
  0xd6   : > { %1065 = vrot.lane.b32.xlu1 %v1018_v7, %s2766_s7  ;;  %1375 = vst.msk [vmem:[#allocation3 + $0x28] sm:$0xf] %vm1364_vm12, %v1337_v20  ;;  %s316_s7 = sadd.s32 %s2490_s6, %s2489_s5 }
  0xd7   : > { %1324 = vrot.lane.b32.xlu0 %v1185_v14, %s2767_s8  ;;  %v1402_v14 = vld [vmem:[#allocation2 + $0x60] sm:$0xe] }
  0xd8   : > { %v1339_v26 = vpop.permute.xlu1 %1338  ;;  %v2537_v22 = vrot.slane %v1402_v14, 9 }
  0xd9   : > { %1376 = vst.msk [vmem:[#allocation3 + $0x2c] sm:$0xf] %vm1364_vm12, %v1339_v26  ;;  %v1486_v32 = vpop.permute.xlu0 %1485 }
  0xda   : > { %1326 = vrot.lane.b32.xlu1 %v1195_v23, %s2767_s8  ;;  %1534 = vst.msk [vmem:[#allocation3] sm:$0xf] %vm1533_vm13, %v1486_v32  ;;  %v1481_v27 = vsel %vm2885_vm4, %v2537_v22, %v1480_v19  ;;  %v1655_v32 = vld [vmem:[#allocation2 + $0x34] sm:$0xf]  ;;  %v1747_v19 = vrot.slane %v1745_v1, 4 }
  0xdb   : > { %1340 = vrot.lane.b32.xlu0 %v1281_v28, %s2767_s8  ;;  %v1654_v28 = vld [vmem:[#allocation2 + $0x30] sm:$0xf]  ;;  %v1730_v38 = vshll.u32 %v1655_v32, 16 }
  0xdc   : > { %v1488_v37 = vpop.permute.xlu1 %1487  ;;  %v1721_v63 = vshrl.u32 %v1654_v28, 16  ;;  %v1724_v34 = vshll.u32 %v1654_v28, 16  ;;  %v1935_v1 = vld [vmem:[#allocation2 + $0x30] sm:$0xe] }
  0xdd   : > { %1535 = vst.msk [vmem:[#allocation3 + $0x4] sm:$0xf] %vm1533_vm13, %v1488_v37  ;;  %v1502_v41 = vpop.permute.xlu0 %1501  ;;  %v3332_v50 = vrot.slane %v1730_v38, 5 }
  0xde   : > { %1342 = vrot.lane.b32.xlu1 %v1291_v33, %s2767_s8  ;;  %1542 = vst.msk [vmem:[#allocation3 + $0x20] sm:$0xf] %vm1533_vm13, %v1502_v41  ;;  %v1667_v41 = vld [vmem:[#allocation2 + $0x64] sm:$0xf]  ;;  %v1726_v44 = vrot.slane %v1724_v34, 5 }
  0xdf   : > { %1328 = vrot.lane.b32.xlu0 %v1209_v17, %s2767_s8  ;;  %v1734_v17 = vshrl.u32 %v1655_v32, 16  ;;  %v1826_v40 = vshll.u32 %v1667_v41, 16  ;;  %v1854_v32 = vshrl.u32 %v1670_v16, 16 }
  0xe0   : > { %v1504_v46 = vpop.permute.xlu1 %1503 }
  0xe1   : > { %1543 = vst.msk [vmem:[#allocation3 + $0x24] sm:$0xf] %vm1533_vm13, %v1504_v46  ;;  %v1490_v52 = vpop.permute.xlu0 %1489  ;;  %v1563_v46 = vld [vmem:[#allocation2 + $0x60] sm:$0xf]  ;;  %v3339_v5 = vrot.slane %v1826_v40, 5 }
  0xe2   : > { %1330 = vrot.lane.b32.xlu1 %v1219_v43, %s2767_s8  ;;  %1536 = vst.msk [vmem:[#allocation3 + $0x8] sm:$0xf] %vm1533_vm13, %v1490_v52  ;;  %v1723_v43 = vrot.slane %v1721_v63, 4  ;;  %v1830_v52 = vshrl.u32 %v1667_v41, 16 }
  0xe3   : > { %1344 = vrot.lane.b32.xlu0 %v1305_v51, %s2767_s8  ;;  %v1736_v51 = vrot.slane %v1734_v17, 4 }
  0xe4   : > { %v1492_v59 = vpop.permute.xlu1 %1491  ;;  %v1727_v58 = vor.u32 %v1726_v44, %v1723_v43  ;;  %v1832_v6 = vrot.slane %v1830_v52, 4 }
  0xe5   : > { %1537 = vst.msk [vmem:[#allocation3 + $0xc] sm:$0xf] %vm1533_vm13, %v1492_v59  ;;  %v1506_v0 = vpop.permute.xlu0 %1505  ;;  %v1819_v59 = vrot.slane %v1817_v29, 4  ;;  %v1856_v29 = vrot.slane %v1854_v32, 4 }
  0xe6   : > { %1346 = vrot.lane.b32.xlu1 %v1315_v55, %s2767_s8  ;;  %1544 = vst.msk [vmem:[#allocation3 + $0x28] sm:$0xf] %vm1533_vm13, %v1506_v0  ;;  %v1564_v55 = vld [vmem:[#allocation2 + $0x64] sm:$0xf]  ;;  %v1748_v0 = vshll.u32 %v1657_v54, 16  ;;  %v1728_v14 = vrot.slane %v1727_v58, 4  ;;  %v1833_v8 = vor.u32 %v1832_v6, %v3339_v5 }
  0xe7   : > { %1493 = vrot.lane.b32.xlu0 %v1446_v62, %s2768_s11  ;;  %v1557_v62 = vld [vmem:[#allocation2 + $0x3c] sm:$0xf]  ;;  %v1937_v6 = vld [vmem:[#allocation2 + $0x38] sm:$0x1] }
  0xe8   : > { %v1508_v7 = vpop.permute.xlu1 %1507  ;;  %v1733_v63 = vsel %vm2917_vm7, %v1728_v14, %v3332_v50 }
  0xe9   : > { %1545 = vst.msk [vmem:[#allocation3 + $0x2c] sm:$0xf] %vm1533_vm13, %v1508_v7  ;;  %v1584_v13 = vpop.permute.xlu0 %1583  ;;  %v1669_v7 = vld [vmem:[#allocation2 + $0x6c] sm:$0xf] }
  0xea   : > { %1495 = vrot.lane.b32.xlu1 %v1449_v3, %s2768_s11  ;;  %1632 = vst.msk [vmem:[#allocation3] sm:$0xf] %vm1631_vm14, %v1584_v13  ;;  %v1737_v3 = vor.u32 %v1736_v51, %v3332_v50  ;;  %v1841_v56 = vshrl.u32 %v1669_v7, 16 }
  0xeb   : > { %1509 = vrot.lane.b32.xlu0 %v1474_v11, %s2768_s11  ;;  %v1754_v11 = vshll.u32 %v1658_v61, 16 }
  0xec   : > { %v1586_v20 = vpop.permute.xlu1 %1585  ;;  %v1843_v36 = vrot.slane %v1841_v56, 4  ;;  %v1939_v56 = vld [vmem:[#allocation2 + $0x40] sm:$0xf] }
  0xed   : > { %1633 = vst.msk [vmem:[#allocation3 + $0x4] sm:$0xf] %vm1631_vm14, %v1586_v20  ;;  %v1600_v23 = vpop.permute.xlu0 %1599  ;;  %v1750_v20 = vrot.slane %v1748_v0, 5  ;;  %v1756_v28 = vrot.slane %v1754_v11, 5 }
  0xee   : > { %1511 = vrot.lane.b32.xlu1 %v1477_v15, %s2768_s11  ;;  %1640 = vst.msk [vmem:[#allocation3 + $0x20] sm:$0xf] %vm1631_vm14, %v1600_v23  ;;  %v1823_v15 = vor.u32 %v1822_v60, %v1819_v59  ;;  %v1566_v23 = vld [vmem:[#allocation2 + $0x70] sm:$0xf]  ;;  %v1936_v59 = vld [vmem:[#allocation2 + $0x34] sm:$0xf] }
  0xef   : > { %1497 = vrot.lane.b32.xlu0 %v1453_v21, %s2768_s11  ;;  %v1844_v21 = vshll.u32 %v1669_v7, 16  ;;  %v1993_v4 = vrot.slane %v1936_v59, 5  ;;  %v1948_v7 = vld [vmem:[#allocation2 + $0x64] sm:$0xf] }
  0xf0   : > { %v1602_v26 = vpop.permute.xlu1 %1601  ;;  %v1824_v34 = vrot.slane %v1823_v15, 4  ;;  %v1996_v15 = vrot.slane %v1937_v6, 5 }
  0xf1   : > { %1641 = vst.msk [vmem:[#allocation3 + $0x24] sm:$0xf] %vm1631_vm14, %v1602_v26  ;;  %v1588_v30 = vpop.permute.xlu0 %1587  ;;  %v1836_v26 = vshll.u32 %v1668_v10, 16  ;;  %v2540_v10 = vrot.slane %v1935_v1, 9  ;;  %v1995_v14 = vrot.slane %v1993_v4, 4 }
  0xf2   : > { %1499 = vrot.lane.b32.xlu1 %v1456_v24, %s2768_s11  ;;  %1634 = vst.msk [vmem:[#allocation3 + $0x8] sm:$0xf] %vm1631_vm14, %v1588_v30  ;;  %v1738_v24 = vrot.slane %v1737_v3, 4  ;;  %v1760_v30 = vrot.slane %v1758_v12, 4  ;;  %v1947_v12 = vld [vmem:[#allocation2 + $0x60] sm:$0xe] }
  0xf3   : > { %1513 = vrot.lane.b32.xlu0 %v1481_v27, %s2768_s11  ;;  %v1659_v27 = vld [vmem:[#allocation2 + $0x44] sm:$0x1] }
  0xf4   : > { %v1590_v33 = vpop.permute.xlu1 %1589  ;;  %v1743_v17 = vsel %vm2917_vm7, %v1738_v24, %v1742_v25  ;;  %v1764_v41 = vshll.u32 %v1659_v27, 16  ;;  %v1761_v43 = vor.u32 %v1760_v30, %v1756_v28  ;;  %v1997_v24 = vsel %vm2885_vm4, %v1995_v14, %v1996_v15 }
  0xf5   : > { %1635 = vst.msk [vmem:[#allocation3 + $0xc] sm:$0xf] %vm1631_vm14, %v1590_v33  ;;  %v1604_v37 = vpop.permute.xlu0 %1603  ;;  %v2000_v27 = vrot.slane %v1939_v56, 5 }
  0xf6   : > { %1515 = vrot.lane.b32.xlu1 %v1484_v31, %s2768_s11  ;;  %1642 = vst.msk [vmem:[#allocation3 + $0x28] sm:$0xf] %vm1631_vm14, %v1604_v37  ;;  %v1850_v31 = vshll.u32 %v1670_v16, 16  ;;  %v1846_v37 = vrot.slane %v1844_v21, 5  ;;  %v1766_v52 = vrot.slane %v1764_v41, 5  ;;  %v1994_v21 = vsel %vm2885_vm4, %v2540_v10, %v1993_v4 }
  0xf7   : > { %1591 = vrot.lane.b32.xlu0 %v1555_v35, %s2769_s15  ;;  %v1751_v35 = vor.u32 %v1750_v20, %v1747_v19  ;;  %v1949_v16 = vld [vmem:[#allocation2 + $0x68] sm:$0x1] }
  0xf8   : > { %v1606_v42 = vpop.permute.xlu1 %1605  ;;  %v1852_v44 = vrot.slane %v1850_v31, 5  ;;  %v1847_v51 = vor.u32 %v1846_v37, %v1843_v36  ;;  %v1951_v31 = vld [vmem:[#allocation2 + $0x70] sm:$0xf]  ;;  %v2002_v36 = vrot.slane %v2000_v27, 4 }
  0xf9   : > { %1643 = vst.msk [vmem:[#allocation3 + $0x2c] sm:$0xf] %vm1631_vm14, %v1606_v42  ;;  %v1865_v49 = vpop.permute.xlu0 %1864  ;;  %v1834_v42 = vrot.slane %v1833_v8, 4  ;;  %v1752_v50 = vrot.slane %v1751_v35, 4  ;;  %v2024_v8 = vrot.slane %v1949_v16, 5 }
  0xfa   : > { %1593 = vrot.lane.b32.xlu1 %v1556_v39, %s2769_s15  ;;  %1913 = vst.msk [vmem:[#allocation3] sm:$0xf] %vm1912_vm15, %v1865_v49  ;;  %v1838_v39 = vrot.slane %v1836_v26, 5  ;;  %v1829_v49 = vsel %vm2917_vm7, %v1824_v34, %v3339_v5  ;;  %v1857_v57 = vor.u32 %v1856_v29, %v1852_v44  ;;  %v1848_v61 = vrot.slane %v1847_v51, 4  ;;  %v1940_v26 = vld [vmem:[#allocation2 + $0x44] sm:$0x1] }
  0xfb   : > { %1607 = vrot.lane.b32.xlu0 %v1563_v46, %s2769_s15  ;;  %v1671_v46 = vld [vmem:[#allocation2 + $0x74] sm:$0x1]  ;;  %v1757_v60 = vsel %vm2917_vm7, %v1752_v50, %v1756_v28  ;;  %v1950_v34 = vld [vmem:[#allocation2 + $0x6c] sm:$0xe]  ;;  %v2003_v37 = vrot.slane %v1940_v26, 5 }
  0xfc   : > { %v1867_v53 = vpop.permute.xlu1 %1866  ;;  %v1839_v54 = vsel %vm2917_vm7, %v1834_v42, %v1838_v39  ;;  %v1952_v39 = vld [vmem:[#allocation2 + $0x74] sm:$0x1]  ;;  %v2545_v42 = vrot.slane %v1950_v34, 9 }
  0xfd   : > { %1914 = vst.msk [vmem:[#allocation3 + $0x4] sm:$0xf] %vm1912_vm15, %v1867_v53  ;;  %v1881_v2 = vpop.permute.xlu0 %1880  ;;  %v1860_v53 = vshll.u32 %v1671_v46, 16 }
  0xfe   : > { %1609 = vrot.lane.b32.xlu1 %v1564_v55, %s2769_s15  ;;  %1921 = vst.msk [vmem:[#allocation3 + $0x20] sm:$0xf] %vm1912_vm15, %v1881_v2  ;;  %v1762_v55 = vrot.slane %v1761_v43, 4  ;;  %v1858_v2 = vrot.slane %v1857_v57, 4 }
  0xff   : > { %1595 = vrot.lane.b32.xlu0 %v1557_v62, %s2769_s15  ;;  %v1862_v3 = vrot.slane %v1860_v53, 5 }
 0x100   : > { %v1883_v13 = vpop.permute.xlu1 %1882  ;;  %v1767_v0 = vsel %vm2917_vm7, %v1762_v55, %v1766_v52 }
 0x101   : > { %1922 = vst.msk [vmem:[#allocation3 + $0x24] sm:$0xf] %vm1912_vm15, %v1883_v13  ;;  %v1869_v22 = vpop.permute.xlu0 %1868  ;;  %v1863_v13 = vsel %vm2917_vm7, %v1858_v2, %v1862_v3 }
 0x102   : > { %1597 = vrot.lane.b32.xlu1 %v1558_v9, %s2769_s15  ;;  %1915 = vst.msk [vmem:[#allocation3 + $0x8] sm:$0xf] %vm1912_vm15, %v1869_v22  ;;  %v1853_v9 = vsel %vm2917_vm7, %v1848_v61, %v1852_v44  ;;  %v2544_v22 = vrot.slane %v1947_v12, 9  ;;  %v2004_v44 = vsel %vm2885_vm4, %v2002_v36, %v2003_v37 }
 0x103   : > { %1611 = vrot.lane.b32.xlu0 %v1565_v18, %s2769_s15  ;;  %v2021_v18 = vrot.slane %v1948_v7, 5 }
 0x104   : > { %v1871_v33 = vpop.permute.xlu1 %1870 }
 0x105   : > { %1916 = vst.msk [vmem:[#allocation3 + $0xc] sm:$0xf] %vm1912_vm15, %v1871_v33  ;;  %v1885_v38 = vpop.permute.xlu0 %1884  ;;  %v2023_v25 = vrot.slane %v2021_v18, 4  ;;  %v2022_v32 = vsel %vm2885_vm4, %v2544_v22, %v2021_v18 }
 0x106   : > { %1613 = vrot.lane.b32.xlu1 %v1566_v23, %s2769_s15  ;;  %1923 = vst.msk [vmem:[#allocation3 + $0x28] sm:$0xf] %vm1912_vm15, %v1885_v38  ;;  %v1938_v23 = vld [vmem:[#allocation2 + $0x3c] sm:$0xe]  ;;  %v2028_v38 = vrot.slane %v1951_v31, 5  ;;  %s2491_s15 = sshll.u32 %s316_s7, 3 }
 0x107   : > { %1872 = vrot.lane.b32.xlu0 %v1733_v63, %s2770_s26  ;;  %v2541_v33 = vrot.slane %v1938_v23, 9  ;;  %v2025_v35 = vsel %vm2885_vm4, %v2023_v25, %v2024_v8 }
 0x108   : > { %v1887_v45 = vpop.permute.xlu1 %1886  ;;  %v2030_v29 = vrot.slane %v2028_v38, 4 }
 0x109   : > { %1924 = vst.msk [vmem:[#allocation3 + $0x2c] sm:$0xf] %vm1912_vm15, %v1887_v45  ;;  %v2034_v40 = vpop.permute.xlu0 %2033  ;;  %v2001_v41 = vsel %vm2885_vm4, %v2541_v33, %v2000_v27  ;;  %v2031_v45 = vrot.slane %v1952_v39, 5 }
 0x10a   : > { %1874 = vrot.lane.b32.xlu1 %v1743_v17, %s2770_s26  ;;  %2082 = vst.msk [vmem:[#allocation3] sm:$0xf] %vm2081_vm0, %v2034_v40 }
 0x10b   : > { %1888 = vrot.lane.b32.xlu0 %v1829_v49, %s2770_s26  ;;  %v2029_v49 = vsel %vm2885_vm4, %v2545_v42, %v2028_v38  ;;  %v2032_v51 = vsel %vm2885_vm4, %v2030_v29, %v2031_v45 }
 0x10c   : > { %v2036_v58 = vpop.permute.xlu1 %2035 }
 0x10d   : > { %2083 = vst.msk [vmem:[#allocation3 + $0x4] sm:$0xf] %vm2081_vm0, %v2036_v58  ;;  %v2050_v62 = vpop.permute.xlu0 %2049 }
 0x10e   : > { %1890 = vrot.lane.b32.xlu1 %v1839_v54, %s2770_s26  ;;  %2090 = vst.msk [vmem:[#allocation3 + $0x20] sm:$0xf] %vm2081_vm0, %v2050_v62 }
 0x10f   : > { %1876 = vrot.lane.b32.xlu0 %v1757_v60, %s2770_s26 }
 0x110   : > { %v2052_v5 = vpop.permute.xlu1 %2051 }
 0x111   : > { %2091 = vst.msk [vmem:[#allocation3 + $0x24] sm:$0xf] %vm2081_vm0, %v2052_v5  ;;  %v774_v11 = vpop.permute.xlu0 %773 }
 0x112   : > { %1878 = vrot.lane.b32.xlu1 %v1767_v0, %s2770_s26  ;;  %818 = vst.msk [vmem:[#allocation3 + $0x10] sm:$0xf] %vm813_vm9, %v774_v11 }
 0x113   : > { %1892 = vrot.lane.b32.xlu0 %v1853_v9, %s2770_s26 }
 0x114   : > { %v776_v19 = vpop.permute.xlu1 %775  ;;  %v2713_v20 = vld [vmem:[#allocation3] sm:$0xff]  }
 0x115   : > { %819 = vst.msk [vmem:[#allocation3 + $0x14] sm:$0xf] %vm813_vm9, %v776_v19  ;;  %2632 = vmatprep.mubr.msk.bf16.mxu0 %vm2197_vm1, %v2713_v20  ;;  %v790_v47 = vpop.permute.xlu0 %789 }
 0x116   : > { %1894 = vrot.lane.b32.xlu1 %v1863_v13, %s2770_s26  ;;  %826 = vst.msk [vmem:[#allocation3 + $0x30] sm:$0xf] %vm813_vm9, %v790_v47 }
 0x117   : > { %2041 = vrot.lane.b32.xlu0 %v1994_v21, %s2771_s27 }
 0x118   : > { %v792_v28 = vpop.permute.xlu1 %791  ;;  %v2715_v30 = vld [vmem:[#allocation3 + $0x20] sm:$0xff]  }
 0x119   : > { %827 = vst.msk [vmem:[#allocation3 + $0x34] sm:$0xf] %vm813_vm9, %v792_v28  ;;  %2640 = vmatprep.mubr.msk.bf16.mxu1 %vm2197_vm1, %v2715_v30  ;;  %v2038_v63 = vpop.permute.xlu0 %2037 }
 0x11a   : > { %2043 = vrot.lane.b32.xlu1 %v1997_v24, %s2771_s27  ;;  %2084 = vst.msk [vmem:[#allocation3 + $0x8] sm:$0xf] %vm2081_vm0, %v2038_v63 }
 0x11b   : > { %2057 = vrot.lane.b32.xlu0 %v2022_v32, %s2771_s27 }
 0x11c   : > { %v2040_v17 = vpop.permute.xlu1 %2039 }
 0x11d   : > { %2085 = vst.msk [vmem:[#allocation3 + $0xc] sm:$0xf] %vm2081_vm0, %v2040_v17  ;;  %v2054_v43 = vpop.permute.xlu0 %2053 }
 0x11e   : > { %2059 = vrot.lane.b32.xlu1 %v2025_v35, %s2771_s27  ;;  %2092 = vst.msk [vmem:[#allocation3 + $0x28] sm:$0xf] %vm2081_vm0, %v2054_v43 }
 0x11f   : > { %2045 = vrot.lane.b32.xlu0 %v2001_v41, %s2771_s27 }
 0x120   : > { %v2056_v46 = vpop.permute.xlu1 %2055 }
 0x121   : > { %2093 = vst.msk [vmem:[#allocation3 + $0x2c] sm:$0xf] %vm2081_vm0, %v2056_v46  ;;  %v778_v50 = vpop.permute.xlu0 %777 }
 0x122   : > { %2047 = vrot.lane.b32.xlu1 %v2004_v44, %s2771_s27  ;;  %820 = vst.msk [vmem:[#allocation3 + $0x18] sm:$0xf] %vm813_vm9, %v778_v50 }
 0x123   : > { %2061 = vrot.lane.b32.xlu0 %v2029_v49, %s2771_s27 }
 0x124   : > { %v780_v40 = vpop.permute.xlu1 %779  ;;  %v2718_v52 = vld [vmem:[#allocation3 + $0x8] sm:$0xff]  }
 0x125   : > { %821 = vst.msk [vmem:[#allocation3 + $0x1c] sm:$0xf] %vm813_vm9, %v780_v40  ;;  %2633 = vmatmul.mubr.msk.bf16.vlgmr.msra.gmra.mxu0 %vm2197_vm1, %v2718_v52  ;;  %v794_v54 = vpop.permute.xlu0 %793  ;;  %v3488_v52 = vld [vmem:[%s3561_s3] ss:$0 sm:$0xff] }
 0x126   : > { %2063 = vrot.lane.b32.xlu1 %v2032_v51, %s2771_s27  ;;  %828 = vst.msk [vmem:[#allocation3 + $0x38] sm:$0xf] %vm813_vm9, %v794_v54  ;;  %s3494_s27 = scalar_lea.vmem %s3562_s4, %s2491_s15 }
 0x128   : > { %v796_v55 = vpop.permute.xlu1 %795  ;;  %v2719_v57 = vld [vmem:[#allocation3 + $0x28] sm:$0xff]  }
 0x129   : > { %829 = vst.msk [vmem:[#allocation3 + $0x3c] sm:$0xf] %vm813_vm9, %v796_v55  ;;  %2641 = vmatmul.mubr.msk.bf16.vlgmr.msra.gmra.mxu1 %vm2197_vm1, %v2719_v57  ;;  %v946_v48 = vpop.permute.xlu0 %945 }
 0x12a   : > { %990 = vst.msk [vmem:[#allocation3 + $0x10] sm:$0xf] %vm985_vm10, %v946_v48 }
 0x12c   : > { %v948_v53 = vpop.permute.xlu1 %947 }
 0x12d   : > { %991 = vst.msk [vmem:[#allocation3 + $0x14] sm:$0xf] %vm985_vm10, %v948_v53  ;;  %v962_v58 = vpop.permute.xlu0 %961 }
 0x12e   : > { %998 = vst.msk [vmem:[#allocation3 + $0x30] sm:$0xf] %vm985_vm10, %v962_v58 }
 0x130   : > { %v964_v59 = vpop.permute.xlu1 %963 }
 0x131   : > { %999 = vst.msk [vmem:[#allocation3 + $0x34] sm:$0xf] %vm985_vm10, %v964_v59  ;;  %v950_v60 = vpop.permute.xlu0 %949 }
 0x132   : > { %992 = vst.msk [vmem:[#allocation3 + $0x18] sm:$0xf] %vm985_vm10, %v950_v60 }
 0x134   : > { %v952_v61 = vpop.permute.xlu1 %951 }
 0x135   : > { %993 = vst.msk [vmem:[#allocation3 + $0x1c] sm:$0xf] %vm985_vm10, %v952_v61  ;;  %v966_v62 = vpop.permute.xlu0 %965 }
 0x136   : > { %1000 = vst.msk [vmem:[#allocation3 + $0x38] sm:$0xf] %vm985_vm10, %v966_v62 }
 0x138   : > { %v968_v1 = vpop.permute.xlu1 %967 }
 0x139   : > { %1001 = vst.msk [vmem:[#allocation3 + $0x3c] sm:$0xf] %vm985_vm10, %v968_v1  ;;  %v1044_v0 = vpop.permute.xlu0 %1043 }
 0x13a   : > { %1088 = vst.msk [vmem:[#allocation3 + $0x10] sm:$0xf] %vm1083_vm11, %v1044_v0 }
 0x13c   : > { %v1046_v2 = vpop.permute.xlu1 %1045 }
 0x13d   : > { %1089 = vst.msk [vmem:[#allocation3 + $0x14] sm:$0xf] %vm1083_vm11, %v1046_v2  ;;  %v1060_v3 = vpop.permute.xlu0 %1059 }
 0x13e   : > { %1096 = vst.msk [vmem:[#allocation3 + $0x30] sm:$0xf] %vm1083_vm11, %v1060_v3 }
 0x140   : > { %v1062_v4 = vpop.permute.xlu1 %1061 }
 0x141   : > { %1097 = vst.msk [vmem:[#allocation3 + $0x34] sm:$0xf] %vm1083_vm11, %v1062_v4  ;;  %v1048_v5 = vpop.permute.xlu0 %1047 }
 0x142   : > { %1090 = vst.msk [vmem:[#allocation3 + $0x18] sm:$0xf] %vm1083_vm11, %v1048_v5 }
 0x144   : > { %v1050_v6 = vpop.permute.xlu1 %1049 }
 0x145   : > { %1091 = vst.msk [vmem:[#allocation3 + $0x1c] sm:$0xf] %vm1083_vm11, %v1050_v6  ;;  %v1064_v7 = vpop.permute.xlu0 %1063 }
 0x146   : > { %1098 = vst.msk [vmem:[#allocation3 + $0x38] sm:$0xf] %vm1083_vm11, %v1064_v7 }
 0x148   : > { %v1066_v9 = vpop.permute.xlu1 %1065 }
 0x149   : > { %1099 = vst.msk [vmem:[#allocation3 + $0x3c] sm:$0xf] %vm1083_vm11, %v1066_v9  ;;  %v1325_v10 = vpop.permute.xlu0 %1324 }
 0x14a   : > { %1369 = vst.msk [vmem:[#allocation3 + $0x10] sm:$0xf] %vm1364_vm12, %v1325_v10 }
 0x14c   : > { %v1327_v11 = vpop.permute.xlu1 %1326 }
 0x14d   : > { %1370 = vst.msk [vmem:[#allocation3 + $0x14] sm:$0xf] %vm1364_vm12, %v1327_v11  ;;  %v1341_v12 = vpop.permute.xlu0 %1340 }
 0x14e   : > { %1377 = vst.msk [vmem:[#allocation3 + $0x30] sm:$0xf] %vm1364_vm12, %v1341_v12 }
 0x150   : > { %v1343_v13 = vpop.permute.xlu1 %1342 }
 0x151   : > { %1378 = vst.msk [vmem:[#allocation3 + $0x34] sm:$0xf] %vm1364_vm12, %v1343_v13  ;;  %v1329_v14 = vpop.permute.xlu0 %1328 }
 0x152   : > { %1371 = vst.msk [vmem:[#allocation3 + $0x18] sm:$0xf] %vm1364_vm12, %v1329_v14 }
 0x154   : > { %v1331_v15 = vpop.permute.xlu1 %1330 }
 0x155   : > { %1372 = vst.msk [vmem:[#allocation3 + $0x1c] sm:$0xf] %vm1364_vm12, %v1331_v15  ;;  %v1345_v16 = vpop.permute.xlu0 %1344 }
 0x156   : > { %1379 = vst.msk [vmem:[#allocation3 + $0x38] sm:$0xf] %vm1364_vm12, %v1345_v16 }
 0x158   : > { %v1347_v18 = vpop.permute.xlu1 %1346 }
 0x159   : > { %1380 = vst.msk [vmem:[#allocation3 + $0x3c] sm:$0xf] %vm1364_vm12, %v1347_v18  ;;  %v1494_v19 = vpop.permute.xlu0 %1493 }
 0x15a   : > { %1538 = vst.msk [vmem:[#allocation3 + $0x10] sm:$0xf] %vm1533_vm13, %v1494_v19 }
 0x15c   : > { %v1496_v20 = vpop.permute.xlu1 %1495 }
 0x15d   : > { %1539 = vst.msk [vmem:[#allocation3 + $0x14] sm:$0xf] %vm1533_vm13, %v1496_v20  ;;  %v1510_v56 = vpop.permute.xlu0 %1509 }
 0x15e   : > { %1546 = vst.msk [vmem:[#allocation3 + $0x30] sm:$0xf] %vm1533_vm13, %v1510_v56 }
 0x160   : > { %v1512_v21 = vpop.permute.xlu1 %1511 }
 0x161   : > { %1547 = vst.msk [vmem:[#allocation3 + $0x34] sm:$0xf] %vm1533_vm13, %v1512_v21  ;;  %v1498_v22 = vpop.permute.xlu0 %1497 }
 0x162   : > { %1540 = vst.msk [vmem:[#allocation3 + $0x18] sm:$0xf] %vm1533_vm13, %v1498_v22 }
 0x164   : > { %v1500_v47 = vpop.permute.xlu1 %1499 }
 0x165   : > { %1541 = vst.msk [vmem:[#allocation3 + $0x1c] sm:$0xf] %vm1533_vm13, %v1500_v47  ;;  %v1514_v23 = vpop.permute.xlu0 %1513 }
 0x166   : > { %1548 = vst.msk [vmem:[#allocation3 + $0x38] sm:$0xf] %vm1533_vm13, %v1514_v23 }
 0x168   : > { %v1516_v24 = vpop.permute.xlu1 %1515 }
 0x169   : > { %1549 = vst.msk [vmem:[#allocation3 + $0x3c] sm:$0xf] %vm1533_vm13, %v1516_v24  ;;  %v1592_v25 = vpop.permute.xlu0 %1591 }
 0x16a   : > { %1636 = vst.msk [vmem:[#allocation3 + $0x10] sm:$0xf] %vm1631_vm14, %v1592_v25 }
 0x16c   : > { %v1594_v8 = vpop.permute.xlu1 %1593 }
 0x16d   : > { %1637 = vst.msk [vmem:[#allocation3 + $0x14] sm:$0xf] %vm1631_vm14, %v1594_v8  ;;  %v1608_v26 = vpop.permute.xlu0 %1607 }
 0x16e   : > { %1644 = vst.msk [vmem:[#allocation3 + $0x30] sm:$0xf] %vm1631_vm14, %v1608_v26 }
 0x170   : > { %v1610_v27 = vpop.permute.xlu1 %1609 }
 0x171   : > { %1645 = vst.msk [vmem:[#allocation3 + $0x34] sm:$0xf] %vm1631_vm14, %v1610_v27  ;;  %v1596_v28 = vpop.permute.xlu0 %1595 }
 0x172   : > { %1638 = vst.msk [vmem:[#allocation3 + $0x18] sm:$0xf] %vm1631_vm14, %v1596_v28 }
 0x174   : > { %v1598_v30 = vpop.permute.xlu1 %1597 }
 0x175   : > { %1639 = vst.msk [vmem:[#allocation3 + $0x1c] sm:$0xf] %vm1631_vm14, %v1598_v30  ;;  %v1612_v31 = vpop.permute.xlu0 %1611 }
 0x176   : > { %1646 = vst.msk [vmem:[#allocation3 + $0x38] sm:$0xf] %vm1631_vm14, %v1612_v31 }
 0x178   : > { %v1614_v32 = vpop.permute.xlu1 %1613 }
 0x179   : > { %1647 = vst.msk [vmem:[#allocation3 + $0x3c] sm:$0xf] %vm1631_vm14, %v1614_v32  ;;  %v1873_v33 = vpop.permute.xlu0 %1872 }
 0x17a   : > { %1917 = vst.msk [vmem:[#allocation3 + $0x10] sm:$0xf] %vm1912_vm15, %v1873_v33 }
 0x17c   : > { %v1875_v63 = vpop.permute.xlu1 %1874 }
 0x17d   : > { %1918 = vst.msk [vmem:[#allocation3 + $0x14] sm:$0xf] %vm1912_vm15, %v1875_v63  ;;  %v1889_v34 = vpop.permute.xlu0 %1888 }
 0x17e   : > { %1925 = vst.msk [vmem:[#allocation3 + $0x30] sm:$0xf] %vm1912_vm15, %v1889_v34 }
 0x180   : > { %v1891_v35 = vpop.permute.xlu1 %1890 }
 0x181   : > { %1926 = vst.msk [vmem:[#allocation3 + $0x34] sm:$0xf] %vm1912_vm15, %v1891_v35  ;;  %v1877_v36 = vpop.permute.xlu0 %1876 }
 0x182   : > { %1919 = vst.msk [vmem:[#allocation3 + $0x18] sm:$0xf] %vm1912_vm15, %v1877_v36 }
 0x184   : > { %v1879_v37 = vpop.permute.xlu1 %1878 }
 0x185   : > { %1920 = vst.msk [vmem:[#allocation3 + $0x1c] sm:$0xf] %vm1912_vm15, %v1879_v37  ;;  %v1893_v38 = vpop.permute.xlu0 %1892 }
 0x186   : > { %1927 = vst.msk [vmem:[#allocation3 + $0x38] sm:$0xf] %vm1912_vm15, %v1893_v38 }
 0x188   : > { %v1895_v17 = vpop.permute.xlu1 %1894 }
 0x189   : > { %1928 = vst.msk [vmem:[#allocation3 + $0x3c] sm:$0xf] %vm1912_vm15, %v1895_v17  ;;  %v2042_v39 = vpop.permute.xlu0 %2041 }
 0x18a   : > { %2086 = vst.msk [vmem:[#allocation3 + $0x10] sm:$0xf] %vm2081_vm0, %v2042_v39 }
 0x18c   : > { %v2044_v41 = vpop.permute.xlu1 %2043 }
 0x18d   : > { %2087 = vst.msk [vmem:[#allocation3 + $0x14] sm:$0xf] %vm2081_vm0, %v2044_v41  ;;  %v2058_v42 = vpop.permute.xlu0 %2057 }
 0x18e   : > { %2094 = vst.msk [vmem:[#allocation3 + $0x30] sm:$0xf] %vm2081_vm0, %v2058_v42 }
 0x190   : > { %v2060_v43 = vpop.permute.xlu1 %2059 }
 0x191   : > { %2095 = vst.msk [vmem:[#allocation3 + $0x34] sm:$0xf] %vm2081_vm0, %v2060_v43  ;;  %v2046_v44 = vpop.permute.xlu0 %2045 }
 0x192   : > { %2088 = vst.msk [vmem:[#allocation3 + $0x18] sm:$0xf] %vm2081_vm0, %v2046_v44 }
 0x194   : > { %v2048_v29 = vpop.permute.xlu1 %2047  ;;  %v2720_v45 = vld [vmem:[#allocation3 + $0x10] sm:$0xff]  }
 0x195   : > { %2089 = vst.msk [vmem:[#allocation3 + $0x1c] sm:$0xf] %vm2081_vm0, %v2048_v29  ;;  %2636 = vmatprep.mubr.msk.bf16.mxu0 %vm2197_vm1, %v2720_v45  ;;  %v2062_v46 = vpop.permute.xlu0 %2061 }
 0x196   : > { %2096 = vst.msk [vmem:[#allocation3 + $0x38] sm:$0xf] %vm2081_vm0, %v2062_v46 }
 0x198   : > { %v2064_v49 = vpop.permute.xlu1 %2063  ;;  %v2721_v50 = vld [vmem:[#allocation3 + $0x30] sm:$0xff]  }
 0x199   : > { %2097 = vst.msk [vmem:[#allocation3 + $0x3c] sm:$0xf] %vm2081_vm0, %v2064_v49  ;;  %2644 = vmatprep.mubr.msk.bf16.mxu1 %vm2197_vm1, %v2721_v50 }
 0x19c   : > { %v2722_v51 = vld [vmem:[#allocation3 + $0x18] sm:$0xff]  }
 0x19d   : > { %2637 = vmatmul.mubr.msk.bf16.gmra.mxu0 %vm2197_vm1, %v2722_v51 }
 0x1a0   : > { %v2723_v40 = vld [vmem:[#allocation3 + $0x38] sm:$0xff]  }
 0x1a1   : > { %2645 = vmatmul.mubr.msk.bf16.gmra.mxu1 %vm2197_vm1, %v2723_v40 }
 0x1e5   : > { %v2634_v54 = vpop.f32.mrf.mxu0 }
 0x1e6   : > { %v2269_v55 = vadd.f32 %v2634_v54, %v3488_v52 }
 0x1e7   : > { %v2260_v57 = vpop.f32.mrf.mxu0 }
 0x1e8   : > { %v2325_v48 = vmax.f32 %v2269_v55, 0.0  ;;  %v2261_v53 = vadd.f32 %v3488_v52, %v2260_v57 }
 0x1e9   : > { %v2635_v58 = vpop.f32.mrf.mxu0  ;;  %v2642_v59 = vpop.f32.mrf.mxu1 }
 0x1ea   : > { %2342 = vst.msk [vmem:[%s3494_s27 + $0x10] sm:$0xff] %vm2339_vm2, %v2325_v48  ;;  %v2323_v60 = vmax.f32 %v2261_v53, 0.0  ;;  %v2272_v61 = vadd.f32 %v2635_v58, %v3488_v52  ;;  %v2301_v62 = vadd.f32 %v2642_v59, %v3488_v52 }
 0x1eb   : > { %v2263_v1 = vpop.f32.mrf.mxu0  ;;  %v2292_v0 = vpop.f32.mrf.mxu1 }
 0x1ec   : > { %2340 = vst.msk [vmem:[%s3494_s27] sm:$0xff] %vm2339_vm2, %v2323_v60  ;;  %v2326_v2 = vmax.f32 %v2272_v61, 0.0  ;;  %v2333_v3 = vmax.f32 %v2301_v62, 0.0  ;;  %v2264_v4 = vadd.f32 %v3488_v52, %v2263_v1  ;;  %v2293_v5 = vadd.f32 %v3488_v52, %v2292_v0 }
 0x1ed   : > { %v2643_v6 = vpop.f32.mrf.mxu1 }
 0x1ee   : > { %2343 = vst.msk [vmem:[%s3494_s27 + $0x18] sm:$0xff] %vm2339_vm2, %v2326_v2  ;;  %2350 = vst.msk [vmem:[%s3494_s27 + $0x50] sm:$0xff] %vm2339_vm2, %v2333_v3  ;;  %v2324_v7 = vmax.f32 %v2264_v4, 0.0  ;;  %v2331_v9 = vmax.f32 %v2293_v5, 0.0  ;;  %v2304_v10 = vadd.f32 %v2643_v6, %v3488_v52 }
 0x1ef   : > { %v2295_v11 = vpop.f32.mrf.mxu1 }
 0x1f0   : > { %2341 = vst.msk [vmem:[%s3494_s27 + $0x8] sm:$0xff] %vm2339_vm2, %v2324_v7  ;;  %2348 = vst.msk [vmem:[%s3494_s27 + $0x40] sm:$0xff] %vm2339_vm2, %v2331_v9  ;;  %v2334_v12 = vmax.f32 %v2304_v10, 0.0  ;;  %v2296_v13 = vadd.f32 %v3488_v52, %v2295_v11 }
 0x1f2   : > { %2351 = vst.msk [vmem:[%s3494_s27 + $0x58] sm:$0xff] %vm2339_vm2, %v2334_v12  ;;  %v2332_v14 = vmax.f32 %v2296_v13, 0.0 }
 0x1f4   : > { %2349 = vst.msk [vmem:[%s3494_s27 + $0x48] sm:$0xff] %vm2339_vm2, %v2332_v14 }
 0x25d   : > { %v2638_v15 = vpop.f32.mrf.mxu0 }
 0x25e   : > { %v2285_v16 = vadd.f32 %v2638_v15, %v3488_v52 }
 0x25f   : > { %v2276_v18 = vpop.f32.mrf.mxu0 }
 0x260   : > { %v2329_v19 = vmax.f32 %v2285_v16, 0.0  ;;  %v2277_v20 = vadd.f32 %v3488_v52, %v2276_v18 }
 0x261   : > { %v2639_v56 = vpop.f32.mrf.mxu0  ;;  %v2646_v21 = vpop.f32.mrf.mxu1 }
 0x262   : > { %2346 = vst.msk [vmem:[%s3494_s27 + $0x30] sm:$0xff] %vm2339_vm2, %v2329_v19  ;;  %v2327_v22 = vmax.f32 %v2277_v20, 0.0  ;;  %v2288_v47 = vadd.f32 %v2639_v56, %v3488_v52  ;;  %v2317_v23 = vadd.f32 %v2646_v21, %v3488_v52 }
 0x263   : > { %v2279_v24 = vpop.f32.mrf.mxu0  ;;  %v2308_v25 = vpop.f32.mrf.mxu1 }
 0x264   : > { %2344 = vst.msk [vmem:[%s3494_s27 + $0x20] sm:$0xff] %vm2339_vm2, %v2327_v22  ;;  %v2330_v8 = vmax.f32 %v2288_v47, 0.0  ;;  %v2337_v26 = vmax.f32 %v2317_v23, 0.0  ;;  %v2280_v27 = vadd.f32 %v3488_v52, %v2279_v24  ;;  %v2309_v28 = vadd.f32 %v3488_v52, %v2308_v25 }
 0x265   : > { %v2647_v30 = vpop.f32.mrf.mxu1 }
 0x266   : > { %2347 = vst.msk [vmem:[%s3494_s27 + $0x38] sm:$0xff] %vm2339_vm2, %v2330_v8  ;;  %2354 = vst.msk [vmem:[%s3494_s27 + $0x70] sm:$0xff] %vm2339_vm2, %v2337_v26  ;;  %v2328_v31 = vmax.f32 %v2280_v27, 0.0  ;;  %v2335_v32 = vmax.f32 %v2309_v28, 0.0  ;;  %v2320_v33 = vadd.f32 %v2647_v30, %v3488_v52 }
 0x267   : > { %v2311_v63 = vpop.f32.mrf.mxu1 }
 0x268   : > { %2345 = vst.msk [vmem:[%s3494_s27 + $0x28] sm:$0xff] %vm2339_vm2, %v2328_v31  ;;  %2352 = vst.msk [vmem:[%s3494_s27 + $0x60] sm:$0xff] %vm2339_vm2, %v2335_v32  ;;  %v2338_v34 = vmax.f32 %v2320_v33, 0.0  ;;  %v2312_v35 = vadd.f32 %v3488_v52, %v2311_v63 }
 0x26a   : > { %2355 = vst.msk [vmem:[%s3494_s27 + $0x78] sm:$0xff] %vm2339_vm2, %v2338_v34  ;;  %v2336_v36 = vmax.f32 %v2312_v35, 0.0 }
 0x26c   : > { %2353 = vst.msk [vmem:[%s3494_s27 + $0x68] sm:$0xff] %vm2339_vm2, %v2336_v36 }
 0x26d PF: > { %s14_s19 = sadd.s32 1, %s2762_s19   ;;  %s3568_s15 = smov %s2754_s17 }
 0x26e   : > { %p11_p9 = scmp.ge.s32.totalorder %s14_s19, 6   ;;  %s3569_s16 = smov %s2758_s18 }
 0x26f   : > { %s3570_s17 = smov %s3573_s20  ;;  %s3571_s18 = smov %s3577_s21 }
 0x270   :  { %13 = sbr.rel (!%p11_p9) target bundleno = 3 (0x3), region = 72 }

</bundles_post_ra>
